<compile_context>
chip_gen: v6e
topology: v6e:2x2x1
jax: 0.10.0
libtpu: 0.0.40
codegen_flags: <defaults>
</compile_context>

<pallas_src>
import jax
import jax.numpy as jnp
from jax.experimental import pallas as pl
from jax.experimental.pallas import tpu as pltpu


def _make_link_predictor_kernel(num_layers):
    """Kernel over one packed batch tile.

    Ref order: xi, xj, (w0, b0, w1, b1, ..., w_{L-1}, b_{L-1}), out.
    All weights are (pack*fan_in, pack*fan_out) block-diagonal bf16; biases are
    (1, pack*fan_out) f32.  xi/xj blocks are (tile_p, pack*IN).
    """
    def kernel(*refs):
        xi_ref, xj_ref = refs[0], refs[1]
        o_ref = refs[-1]
        wb_refs = refs[2:-1]

        # Elementwise product in the input dtype (bf16 inputs recommended),
        # then bf16 operands for the MXU.
        h = (xi_ref[...] * xj_ref[...]).astype(jnp.bfloat16)

        for li in range(num_layers):
            w = wb_refs[2 * li][...]          # bf16 block-diagonal weight
            b = wb_refs[2 * li + 1][...]      # f32 bias row
            z = jnp.dot(h, w, preferred_element_type=jnp.float32) + b
            if li < num_layers - 1:
                # ReLU in f32, downcast to bf16 only for the next MXU dot.
                h = jnp.maximum(z, 0.0).astype(jnp.bfloat16)
            else:
                h = z                          # final logits, f32

        # sigmoid(z) = 1 / (1 + exp(-z)); both ops go to the EUP slot.
        o_ref[...] = pl.reciprocal(1.0 + jnp.exp(-h), approx=True).astype(o_ref.dtype)

    return kernel


def link_predictor_forward(x_i, x_j, params, *, tile_b=8192):
    """Forward pass of LinkPredictor (eval mode).

    params: list of (W, b) with W: (fan_in, fan_out), b: (1, fan_out)
            (standard "x @ W + b" layout).
    x_i, x_j: (N, IN); any float dtype (bf16 recommended for bandwidth).
    Returns (N, out_channels) float32 probabilities.
    """
    assert tile_b % 128 == 0, "tile_b must be a multiple of 128"
    N, IN = x_i.shape
    num_layers = len(params)
    OUT = params[-1][0].shape[1]

    # ---- choose lane-packing factor (4 logical rows per 128-lane vreg for IN=32).
    if 128 % IN == 0:
        pack = 128 // IN
        if pack > 1 and N % pack != 0:
            pack = 1          # ragged vs pack -> fall back; never jnp.pad inputs.
    else:
        pack = 1

    Np = N // pack
    xi_p = x_i.reshape(Np, pack * IN)     # contiguous row-major reshape: free
    xj_p = x_j.reshape(Np, pack * IN)

    # ---- batch tile (in packed rows); keep it a multiple of 8 sublanes.
    tile_p = max(8, (tile_b // pack) // 8 * 8)
    tile_p = min(tile_p, max(8, (Np + 7) // 8 * 8))
    n_tiles = pl.cdiv(Np, tile_p)
    if n_tiles == 1 and Np > 8:
        # Split so a 2-TensorCore chip (v7x) gets work on both cores.
        tile_p = ((Np + 1) // 2 + 7) // 8 * 8
        n_tiles = pl.cdiv(Np, tile_p)

    # ---- replicated block-diagonal weights (bf16) and tiled biases (f32).
    flat_params = []
    eye = jnp.eye(pack, dtype=jnp.float32)
    for (w, b) in params:
        w_blk = jnp.kron(eye, w.astype(jnp.float32)).astype(jnp.bfloat16)
        b_row = jnp.tile(b.reshape(1, -1).astype(jnp.float32), (1, pack))
        flat_params.extend([w_blk, b_row])

    # ---- specs
    row_map = lambda i: (i, 0)
    const_map = lambda i: (0, 0)
    in_specs = [
        pl.BlockSpec((tile_p, pack * IN), row_map),   # x_i tile
        pl.BlockSpec((tile_p, pack * IN), row_map),   # x_j tile
    ]
    for arr in flat_params:                            # weights/biases: resident
        in_specs.append(pl.BlockSpec(arr.shape, const_map))

    out = pl.pallas_call(
        _make_link_predictor_kernel(num_layers),
        out_shape=jax.ShapeDtypeStruct((Np, pack * OUT), jnp.float32),
        grid_spec=pltpu.PrefetchScalarGridSpec(
            num_scalar_prefetch=0,
            grid=(n_tiles,),
            in_specs=in_specs,
            out_specs=pl.BlockSpec((tile_p, pack * OUT), row_map),
        ),
        compiler_params=pltpu.CompilerParams(
            dimension_semantics=("parallel",)),
    )(xi_p, xj_p, *flat_params)

    # (Np, pack*OUT) row-major == logical rows in order -> (N, OUT); free reshape.
    return out.reshape(N, OUT)


def init_params(key, in_channels, hidden_channels, out_channels, num_layers):
    """Deterministic init mimicking torch.nn.Linear default (uniform +/- 1/sqrt(fan_in)).
    Weights stored transposed: (in_features, out_features); biases (1, out_features)."""
    dims = [in_channels] + [hidden_channels] * (num_layers - 1) + [out_channels]
    params = []
    for li in range(num_layers):
        fan_in, fan_out = dims[li], dims[li + 1]
        key, kw, kb = jax.random.split(key, 3)
        bound = 1.0 / jnp.sqrt(fan_in)
        w = jax.random.uniform(kw, (fan_in, fan_out), jnp.float32, -bound, bound)
        b = jax.random.uniform(kb, (1, fan_out), jnp.float32, -bound, bound)
        params.append((w, b))
    return params


def reference_forward(x_i, x_j, params):
    """Pure-JAX f32 reference (same math as the PyTorch module in eval mode)."""
    x = x_i.astype(jnp.float32) * x_j.astype(jnp.float32)
    for w, b in params[:-1]:
        x = jnp.maximum(x @ w + b, 0.0)
    w, b = params[-1]
    return jax.nn.sigmoid(x @ w + b)


if __name__ == "__main__":
    # num_layers=3, OUT=1.  N is a multiple of 4 (so the free packed reshape is
    # used) but NOT a multiple of the tile, exercising the ragged tail block,
    # and spans multiple grid steps (grid length 3 with tile_b=1024).
    N, IN, HID, OUT = 2500, 32, 32, 1
    key = jax.random.PRNGKey(0)
    k_i, k_j, k_p = jax.random.split(key, 3)

    # bf16 inputs: halves HBM traffic for the dominant input streams.
    x_i = jax.random.normal(k_i, (N, IN), jnp.bfloat16)
    x_j = jax.random.normal(k_j, (N, IN), jnp.bfloat16)
    params = init_params(k_p, IN, HID, OUT, num_layers=3)

    out = link_predictor_forward(x_i, x_j, params, tile_b=1024)
    out = jax.block_until_ready(out)

    ref = reference_forward(x_i, x_j, params)
    assert out.shape == (N, OUT)
    assert bool(jnp.all(jnp.isfinite(out)))
    # bf16 MXU operands + approx reciprocal => tolerance looser than a pure-f32 check.
    max_diff = float(jnp.max(jnp.abs(out - ref)))
    assert jnp.allclose(out, ref, atol=2e-2, rtol=2e-2), (
        "mismatch vs pure-JAX reference: max abs diff = %g" % max_diff)

    print("KERNEL_OK")
</pallas_src>

<mosaic_0001>
module attributes {stable_mosaic.version = 11 : i64} {
  func.func @kernel(%arg0: i32, %arg1: memref<256x128xbf16, #tpu.memory_space<vmem>>, %arg2: memref<256x128xbf16, #tpu.memory_space<vmem>>, %arg3: memref<128x128xbf16, #tpu.memory_space<vmem>>, %arg4: memref<1x128xf32, #tpu.memory_space<vmem>>, %arg5: memref<128x128xbf16, #tpu.memory_space<vmem>>, %arg6: memref<1x128xf32, #tpu.memory_space<vmem>>, %arg7: memref<128x4xbf16, #tpu.memory_space<vmem>>, %arg8: memref<1x4xf32, #tpu.memory_space<vmem>>, %arg9: memref<256x4xf32, #tpu.memory_space<vmem>>) attributes {dimension_semantics = [#tpu.dimension_semantics<parallel>], iteration_bounds = array<i64: 3>, scalar_prefetch = 0 : i64, scratch_operands = 0 : i64, tpu.core_type = #tpu.core_type<tc>, window_params = [{transform_indices = @transform_0, window_bounds = array<i64: 256, 128>}, {transform_indices = @transform_1, window_bounds = array<i64: 256, 128>}, {pipeline_mode = #tpu.pipeline_mode<synchronous>, transform_indices = @transform_2, window_bounds = array<i64: 128, 128>}, {pipeline_mode = #tpu.pipeline_mode<synchronous>, transform_indices = @transform_3, window_bounds = array<i64: 1, 128>}, {pipeline_mode = #tpu.pipeline_mode<synchronous>, transform_indices = @transform_4, window_bounds = array<i64: 128, 128>}, {pipeline_mode = #tpu.pipeline_mode<synchronous>, transform_indices = @transform_5, window_bounds = array<i64: 1, 128>}, {pipeline_mode = #tpu.pipeline_mode<synchronous>, transform_indices = @transform_6, window_bounds = array<i64: 128, 4>}, {pipeline_mode = #tpu.pipeline_mode<synchronous>, transform_indices = @transform_7, window_bounds = array<i64: 1, 4>}, {transform_indices = @transform_8, window_bounds = array<i64: 256, 4>}]} {
    %c0 = arith.constant 0 : index
    %c0_0 = arith.constant 0 : index
    %0 = vector.load %arg1[%c0, %c0_0] : memref<256x128xbf16, #tpu.memory_space<vmem>>, vector<256x128xbf16>
    %c0_1 = arith.constant 0 : index
    %c0_2 = arith.constant 0 : index
    %1 = vector.load %arg2[%c0_1, %c0_2] : memref<256x128xbf16, #tpu.memory_space<vmem>>, vector<256x128xbf16>
    %2 = arith.mulf %0, %1 : vector<256x128xbf16>
    %c0_3 = arith.constant 0 : index
    %c0_4 = arith.constant 0 : index
    %3 = vector.load %arg3[%c0_3, %c0_4] : memref<128x128xbf16, #tpu.memory_space<vmem>>, vector<128x128xbf16>
    %c0_5 = arith.constant 0 : index
    %c0_6 = arith.constant 0 : index
    %4 = vector.load %arg4[%c0_5, %c0_6] : memref<1x128xf32, #tpu.memory_space<vmem>>, vector<1x128xf32>
    %cst = arith.constant dense<0.000000e+00> : vector<256x128xf32>
    %5 = tpu.matmul %2, %3, %cst {dimension_numbers = #tpu.dot_dimension_numbers<[1], [0], [0], [1], [0, 0, 1, 1], [], []>} : vector<256x128xbf16>, vector<128x128xbf16>, vector<256x128xf32> -> vector<256x128xf32>
    %6 = vector.broadcast %4 : vector<1x128xf32> to vector<256x128xf32>
    %7 = arith.addf %5, %6 : vector<256x128xf32>
    %cst_7 = arith.constant 0.000000e+00 : f32
    %8 = vector.broadcast %cst_7 : f32 to vector<256x128xf32>
    %9 = arith.maximumf %7, %8 : vector<256x128xf32>
    %10 = arith.truncf %9 : vector<256x128xf32> to vector<256x128xbf16>
    %c0_8 = arith.constant 0 : index
    %c0_9 = arith.constant 0 : index
    %11 = vector.load %arg5[%c0_8, %c0_9] : memref<128x128xbf16, #tpu.memory_space<vmem>>, vector<128x128xbf16>
    %c0_10 = arith.constant 0 : index
    %c0_11 = arith.constant 0 : index
    %12 = vector.load %arg6[%c0_10, %c0_11] : memref<1x128xf32, #tpu.memory_space<vmem>>, vector<1x128xf32>
    %cst_12 = arith.constant dense<0.000000e+00> : vector<256x128xf32>
    %13 = tpu.matmul %10, %11, %cst_12 {dimension_numbers = #tpu.dot_dimension_numbers<[1], [0], [0], [1], [0, 0, 1, 1], [], []>} : vector<256x128xbf16>, vector<128x128xbf16>, vector<256x128xf32> -> vector<256x128xf32>
    %14 = vector.broadcast %12 : vector<1x128xf32> to vector<256x128xf32>
    %15 = arith.addf %13, %14 : vector<256x128xf32>
    %cst_13 = arith.constant 0.000000e+00 : f32
    %16 = vector.broadcast %cst_13 : f32 to vector<256x128xf32>
    %17 = arith.maximumf %15, %16 : vector<256x128xf32>
    %18 = arith.truncf %17 : vector<256x128xf32> to vector<256x128xbf16>
    %c0_14 = arith.constant 0 : index
    %c0_15 = arith.constant 0 : index
    %19 = vector.load %arg7[%c0_14, %c0_15] : memref<128x4xbf16, #tpu.memory_space<vmem>>, vector<128x4xbf16>
    %c0_16 = arith.constant 0 : index
    %c0_17 = arith.constant 0 : index
    %20 = vector.load %arg8[%c0_16, %c0_17] : memref<1x4xf32, #tpu.memory_space<vmem>>, vector<1x4xf32>
    %cst_18 = arith.constant dense<0.000000e+00> : vector<256x4xf32>
    %21 = tpu.matmul %18, %19, %cst_18 {dimension_numbers = #tpu.dot_dimension_numbers<[1], [0], [0], [1], [0, 0, 1, 1], [], []>} : vector<256x128xbf16>, vector<128x4xbf16>, vector<256x4xf32> -> vector<256x4xf32>
    %22 = vector.broadcast %20 : vector<1x4xf32> to vector<256x4xf32>
    %23 = arith.addf %21, %22 : vector<256x4xf32>
    %cst_19 = arith.constant 0.000000e+00 : f32
    %24 = vector.broadcast %cst_19 : f32 to vector<256x4xf32>
    %25 = arith.subf %24, %23 : vector<256x4xf32>
    %26 = math.exp %25 : vector<256x4xf32>
    %cst_20 = arith.constant 1.000000e+00 : f32
    %27 = vector.broadcast %cst_20 : f32 to vector<256x4xf32>
    %28 = arith.addf %27, %26 : vector<256x4xf32>
    %29 = tpu.reciprocal %28 {approx = true} : vector<256x4xf32> -> vector<256x4xf32>
    %c0_21 = arith.constant 0 : index
    %c0_22 = arith.constant 0 : index
    %30 = vector.load %arg9[%c0_21, %c0_22] : memref<256x4xf32, #tpu.memory_space<vmem>>, vector<256x4xf32>
    tpu.vector_store %arg9[%c0_21, %c0_22], %29 {strides = array<i32>} : memref<256x4xf32, #tpu.memory_space<vmem>>, vector<256x4xf32>,
    return
  }
  func.func @transform_0(%arg0: i32) -> (i32, i32) {
    %c0_i32 = arith.constant 0 : i32
    %c0_i32_0 = arith.constant 0 : i32
    return %arg0, %c0_i32 : i32, i32
  }
  func.func @transform_1(%arg0: i32) -> (i32, i32) {
    %c0_i32 = arith.constant 0 : i32
    %c0_i32_0 = arith.constant 0 : i32
    return %arg0, %c0_i32 : i32, i32
  }
  func.func @transform_2(%arg0: i32) -> (i32, i32) {
    %c0_i32 = arith.constant 0 : i32
    %c0_i32_0 = arith.constant 0 : i32
    %c0_i32_1 = arith.constant 0 : i32
    return %c0_i32, %c0_i32_0 : i32, i32
  }
  func.func @transform_3(%arg0: i32) -> (i32, i32) {
    %c0_i32 = arith.constant 0 : i32
    %c0_i32_0 = arith.constant 0 : i32
    %c0_i32_1 = arith.constant 0 : i32
    return %c0_i32, %c0_i32_0 : i32, i32
  }
  func.func @transform_4(%arg0: i32) -> (i32, i32) {
    %c0_i32 = arith.constant 0 : i32
    %c0_i32_0 = arith.constant 0 : i32
    %c0_i32_1 = arith.constant 0 : i32
    return %c0_i32, %c0_i32_0 : i32, i32
  }
  func.func @transform_5(%arg0: i32) -> (i32, i32) {
    %c0_i32 = arith.constant 0 : i32
    %c0_i32_0 = arith.constant 0 : i32
    %c0_i32_1 = arith.constant 0 : i32
    return %c0_i32, %c0_i32_0 : i32, i32
  }
  func.func @transform_6(%arg0: i32) -> (i32, i32) {
    %c0_i32 = arith.constant 0 : i32
    %c0_i32_0 = arith.constant 0 : i32
    %c0_i32_1 = arith.constant 0 : i32
    return %c0_i32, %c0_i32_0 : i32, i32
  }
  func.func @transform_7(%arg0: i32) -> (i32, i32) {
    %c0_i32 = arith.constant 0 : i32
    %c0_i32_0 = arith.constant 0 : i32
    %c0_i32_1 = arith.constant 0 : i32
    return %c0_i32, %c0_i32_0 : i32, i32
  }
  func.func @transform_8(%arg0: i32) -> (i32, i32) {
    %c0_i32 = arith.constant 0 : i32
    %c0_i32_0 = arith.constant 0 : i32
    return %arg0, %c0_i32 : i32, i32
  }
}

</mosaic_0001>

<bundles_post_ra>
// kernel: tpu_custom_call.1
= control target key start
LH: loop header
LB: loop body
LE: loop exit
PB: predicated region body
PF: predicated region fallthrough
CT: control target
= control target key end

     0   :  { %s3411_s0 = inlined_call_operand.hbm [shape: bf16[625,128], index: 0, kind: input, shape index: {}]   ;;  %s3412_s1 = inlined_call_operand.hbm [shape: bf16[625,128], index: 1, kind: input, shape index: {}]   ;;  %s3413_s2 = inlined_call_operand.vmem [shape: bf16[128,128], index: 2, kind: input, shape index: {}]   ;;  %s3414_s3 = inlined_call_operand.vmem [shape: f32[1,128], index: 3, kind: input, shape index: {}]   ;;  %s3415_s4 = inlined_call_operand.hbm [shape: bf16[128,128], index: 4, kind: input, shape index: {}]   ;;  %s3416_s5 = inlined_call_operand.vmem [shape: f32[1,128], index: 5, kind: input, shape index: {}]   ;;  %s3417_s6 = inlined_call_operand.vmem [shape: bf16[128,4], index: 6, kind: input, shape index: {}]   ;;  %s3418_s7 = inlined_call_operand.vmem [shape: f32[1,4], index: 7, kind: input, shape index: {}]   ;;  %s3419_s8 = inlined_call_operand.vmem [shape: f32[625,4], index: 8, kind: output, shape index: {}]  }
   0x1   :  { %3422 = sst [smem:[#allocation12_spill]] %s3415_s4 }
   0x2   :  { %13 = vsyncpa [#allocation3], 0 }
   0x3   :  { %15 = vsyncpa [#allocation3 + $0x1], 0 }
   0x4   :  { %16 = vsyncpa [#allocation5], 0 }
   0x5   :  { %18 = vsyncpa [#allocation5 + $0x1], 0  ;;  %s2789_s27 = smov 0   ;;  %s2791_s28 = smov 0  }
   0x6   :  { %s2793_s29 = smov 0   ;;  %s2795_s30 = smov 0  }
   0x7 LB: > { %s2808_s9 = sadd.s32 4294967295, %s2701_s30   ;;  %s2811_s10 = sadd.s32 1, %s2701_s30   ;;  %s2701_s30 = sphi %s2795_s30, %s3442_s30   ;;  %s2697_s29 = sphi %s2793_s29, %s3441_s29   ;;  %s2693_s28 = sphi %s2791_s28, %s3440_s28   ;;  %s2689_s27 = sphi %s2789_s27, %s3439_s27  }
   0x8   : > { %s28_s11 = ssub.s32 %s2701_s30, %s2811_s10  ;;  %s31_s12 = sadd.s32 1, %s2697_s29 }
   0x9   : > { %p29_p0 = scmp.eq.s32.totalorder %s28_s11, 0  ;;  %p38_p1 = scmp.ne.s32.totalorder %s2697_s29, %s2693_s28 }
   0xa   : > { %p39_p2 = scmp.eq.s32.totalorder %s2701_s30, 0  ;;  %p44_p3 = scmp.ne.s32.totalorder %s2693_s28, %s2689_s27 }
   0xb   : > { %s2821_s13 = scalar_select %p29_p0, %s2697_s29, %s31_s12  }
   0xc   : > { %p2823_p4 = por %p39_p2, %p38_p1  ;;  %p3421_p5 = scmp.eq.s32.totalorder %s2808_s9, 0 }
   0xd   : > { %3423 = sst [smem:[#allocation11_spill]] %s2821_s13  ;;  %p220_p6 = scmp.eq.s32.totalorder %s2808_s9, 2 }
   0xe   : > { %p1963_p7 = scmp.ge.s32.totalorder %s2701_s30, 1  ;;  %p2832_p8 = por %p3421_p5, %p44_p3 }
   0xf   : > { %p233_p9 = scmp.lt.s32.totalorder %s2701_s30, 4  ;;  %p2837_p10 = por %p220_p6, %p38_p1 }
  0x10   : > { %s3425_s15 = scalar_select %p2832_p8, 1, 0 }
  0x11   : > { %s3426_s16 = scalar_select %p2837_p10, 1, 0 }
  0x12   : > { %p2841_p11 = pnand %p1963_p7, %p233_p9  ;;  %s2735_s18 = smov [#allocation6]  }
  0x13   : > { %s251_s19 = sshll.u32 %s2735_s18, 4  ;;  %s252_s19 = int_to_ptr.vmem [resolvable:$true] %s251_s19 }
  0x14   : > { %p2288_p12 = pneg %p2841_p11  ;;  %s2560_s20 = scalar_lea.vmem %s252_s19, 1024 }
  0x15   : > { %p2561_p2 = scmp.ne.s32.totalorder %s252_s19, %s2560_s20  ;;  %p2568_p6 = scmp.lt.s32.totalorder %s252_s19, %s252_s19 }
  0x16   : > { %p2289_p13 = pnand %p2288_p12, %p3421_p5  ;;  %p2569_p8 = scmp.lt.s32.totalorder %s2560_s20, %s2560_s20 }
  0x18   : > { %p2551_p0 = pneg %p2289_p13  ;;  %p2570_p10 = por %p2569_p8, %p2568_p6 }
  0x1a   : > { %p2563_p3 = pnand %p2561_p2, %p2551_p0 }
  0x1c   : > { %p2564_p1 = pneg %p2563_p3 }
  0x1e   : > { %p2571_p7 = pnand %p2570_p10, %p2564_p1 }
  0x20   : > { %2574 = shalt.err (!%p2571_p7)
}
  0x21   : > { %s2736_s21 = smov 64   ;;  %s2737_s22 = smov 4  }
  0x22   : > { %s3428_s4 = sld [smem:[#allocation12_spill]]  ;;  %p1965_p9 = scmp.ge.s32.totalorder %s2701_s30, 3 }
  0x24   : > { %270 = sbr.rel (%p1965_p9) target bundleno = 105 (0x69), region = 40 }
  0x28   : > { %2291 = dma.hbm_to_vmem [thread:$0]  (!%p2289_p13), %s3428_s4, 1024, %s252_s19, [#allocation5], %s2736_s21, %s2736_s21, %s2737_s22  }
  0x29   : > { %273 = sbr.rel (!%p2823_p4) target bundleno = 73 (0x49), region = 44  ;;  %s274_s25 = sand.u32 (%p2823_p4), 1, %s2697_s29  }
  0x2a   : > { %s1967_s26 = sshll.u32 (%p2823_p4), %s2701_s30, 5  ;;  %s1966_s27 = sshll.u32 (%p2823_p4), %s274_s25, 7 }
  0x2b   : > { %s280_s11 = ssub.s32 (%p2823_p4), 79, %s1967_s26  ;;  %s2860_s20 = scalar_lea.sflag (%p2823_p4), [#allocation3], %s274_s25 }
  0x2c   : > { %p281_p8 = scmp.lt.s32.totalorder (%p2823_p4), %s280_s11, 32  ;;  %s278_s19 = scalar_lea.vmem (%p2823_p4), [#allocation2], %s1966_s27 }
  0x2e   : > { %s3444_s11 = smov (!%p281_p8, %s280_s11), 32 }
  0x2f   : > { %s2857_s12 = sshll.u32 %s3444_s11, 6 }
  0x30   : > { %s285_s18 = ssub.s32 2048, %s2857_s12 }
  0x31   : > { %286 = vsyncadd %s2860_s20, %s285_s18  ;;  %p1969_p10 = scmp.ne.s32.totalorder %s2857_s12, 0  ;;  %s2045_s21 = sshll.u32 %s2701_s30, 11 }
  0x32   : > { %s2868_s24 = scalar_lea.hbm %s3411_s0, %s2045_s21  ;;  %s291_s26 = sshll.u32 %s278_s19, 4  ;;  %s2870_s26 = int_to_ptr.vmem [resolvable:$true] %s291_s26 }
  0x33   : > { %s2575_s25 = scalar_lea.hbm %s2868_s24, %s2857_s12  ;;  %s2579_s18 = scalar_lea.hbm %s3411_s0, 5056 }
  0x34   : > { %p2576_p12 = scmp.ne.s32.totalorder %s2868_s24, %s2575_s25  ;;  %p2580_p2 = scmp.lt.s32.totalorder %s2868_s24, %s3411_s0 }
  0x35   : > { %p2581_p3 = scmp.lt.s32.totalorder %s2579_s18, %s2575_s25 }
  0x36   : > { %p2577_p13 = pnand %p2576_p12, %p1969_p10 }
  0x37   : > { %p2582_p1 = por %p2581_p3, %p2580_p2 }
  0x38   : > { %p2578_p0 = pneg %p2577_p13 }
  0x3a   : > { %p2583_p6 = pnand %p2582_p1, %p2578_p0 }
  0x3c   : > { %2586 = shalt.err (!%p2583_p6)
}
  0x3d   : > { %s2587_s19 = scalar_lea.vmem %s2870_s26, %s2857_s12  ;;  %s2738_s21 = smov [#allocation2]  }
  0x3e   : > { %p2588_p7 = scmp.ne.s32.totalorder %s2870_s26, %s2587_s19  ;;  %s2591_s22 = sshll.u32 %s2738_s21, 4  ;;  %s2592_s22 = int_to_ptr.vmem [resolvable:$false] %s2591_s22 }
  0x3f   : > { %s2593_s23 = scalar_lea.vmem %s2592_s22, 4096  ;;  %p2594_p12 = scmp.lt.s32.totalorder %s2870_s26, %s2592_s22 }
  0x40   : > { %p2589_p9 = pnand %p2588_p7, %p1969_p10  ;;  %p2595_p13 = scmp.lt.s32.totalorder %s2593_s23, %s2587_s19 }
  0x42   : > { %p2590_p8 = pneg %p2589_p9  ;;  %p2596_p5 = por %p2595_p13, %p2594_p12 }
  0x44   : > { %p2597_p2 = pnand %p2596_p5, %p2590_p8 }
  0x46   : > { %2600 = shalt.err (!%p2597_p2)
}
  0x47   : > { %s2739_s4 = smov 64   ;;  %s2740_s13 = smov 4  }
  0x48   : > { %297 = dma.hbm_to_vmem [thread:$0]  (%p1969_p10), %s2868_s24, %s2857_s12, %s2870_s26, %s2860_s20, %s2739_s4, %s2739_s4, %s2740_s13  }
  0x49 PF: > { %300 = sbr.rel (!%p2823_p4) target bundleno = 105 (0x69), region = 48  ;;  %s301_s25 = sand.u32 (%p2823_p4), 1, %s2701_s30  }
  0x4a   : > { %s303_s27 = sand.u32 (%p2823_p4), 1, %s2697_s29   ;;  %s1974_s18 = sshll.u32 (%p2823_p4), %s2701_s30, 5 }
  0x4b   : > { %s1973_s11 = sshll.u32 (%p2823_p4), %s303_s27, 7  ;;  %s307_s19 = ssub.s32 (%p2823_p4), 79, %s1974_s18 }
  0x4c   : > { %p308_p5 = scmp.lt.s32.totalorder (%p2823_p4), %s307_s19, 32  ;;  %s2904_s23 = scalar_lea.sflag (%p2823_p4), [#allocation5], %s301_s25 }
  0x4d   : > { %s305_s12 = scalar_lea.vmem (%p2823_p4), [#allocation4], %s1973_s11 }
  0x4e   : > { %s3446_s19 = smov (!%p308_p5, %s307_s19), 32 }
  0x4f   : > { %s2901_s21 = sshll.u32 %s3446_s19, 6 }
  0x50   : > { %s312_s22 = ssub.s32 2048, %s2901_s21 }
  0x51   : > { %313 = vsyncadd %s2904_s23, %s312_s22  ;;  %p1976_p4 = scmp.ne.s32.totalorder %s2901_s21, 0  ;;  %s2046_s14 = sshll.u32 %s2701_s30, 11 }
  0x52   : > { %s2912_s26 = scalar_lea.hbm %s3412_s1, %s2046_s14  ;;  %s318_s4 = sshll.u32 %s305_s12, 4  ;;  %s2914_s4 = int_to_ptr.vmem [resolvable:$true] %s318_s4 }
  0x53   : > { %s2601_s13 = scalar_lea.hbm %s2912_s26, %s2901_s21  ;;  %s2605_s30 = scalar_lea.hbm %s3412_s1, 5056 }
  0x54   : > { %p2602_p10 = scmp.ne.s32.totalorder %s2912_s26, %s2601_s13  ;;  %p2606_p1 = scmp.lt.s32.totalorder %s2912_s26, %s3412_s1 }
  0x55   : > { %p2607_p6 = scmp.lt.s32.totalorder %s2605_s30, %s2601_s13 }
  0x56   : > { %p2603_p0 = pnand %p2602_p10, %p1976_p4 }
  0x57   : > { %p2608_p7 = por %p2607_p6, %p2606_p1 }
  0x58   : > { %p2604_p3 = pneg %p2603_p0 }
  0x5a   : > { %p2609_p9 = pnand %p2608_p7, %p2604_p3 }
  0x5c   : > { %2612 = shalt.err (!%p2609_p9)
}
  0x5d   : > { %s2613_s19 = scalar_lea.vmem %s2914_s4, %s2901_s21  ;;  %s2741_s22 = smov [#allocation4]  }
  0x5e   : > { %p2614_p8 = scmp.ne.s32.totalorder %s2914_s4, %s2613_s19  ;;  %s2617_s12 = sshll.u32 %s2741_s22, 4  ;;  %s2618_s12 = int_to_ptr.vmem [resolvable:$false] %s2617_s12 }
  0x5f   : > { %s2619_s14 = scalar_lea.vmem %s2618_s12, 4096  ;;  %p2620_p2 = scmp.lt.s32.totalorder %s2914_s4, %s2618_s12 }
  0x60   : > { %p2615_p12 = pnand %p2614_p8, %p1976_p4  ;;  %p2621_p5 = scmp.lt.s32.totalorder %s2619_s14, %s2613_s19 }
  0x62   : > { %p2616_p13 = pneg %p2615_p12  ;;  %p2622_p10 = por %p2621_p5, %p2620_p2 }
  0x64   : > { %p2623_p0 = pnand %p2622_p10, %p2616_p13 }
  0x66   : > { %2626 = shalt.err (!%p2623_p0)
}
  0x67   : > { %s2742_s20 = smov 64   ;;  %s2743_s24 = smov 4  }
  0x68   : > { %324 = dma.hbm_to_vmem [thread:$0]  (%p1976_p4), %s2912_s26, %s2901_s21, %s2914_s4, %s2904_s23, %s2742_s20, %s2742_s20, %s2743_s24  }
  0x69 PF: > { %330 = sbr.rel (%p2841_p11) target bundleno = 903 (0x387), region = 52  ;;  %s2943_s13 = sand.u32 (!%p2841_p11), 1, %s2693_s28  }
  0x6a   : > { %s1981_s25 = sshll.u32 (!%p2841_p11), %s2943_s13, 7  ;;  %s333_s27 = scalar_lea.sflag (!%p2841_p11), [#allocation3], %s2943_s13 }
  0x6b   : > { %s2947_s30 = scalar_lea.vmem (!%p2841_p11), [#allocation2], %s1981_s25  ;;  %p3429_p3 = scmp.ne.s32.totalorder (!%p2841_p11), %s3425_s15, 0 }
  0x6e   : > { %2676 = dma.done.wait (%p3429_p3), %s333_s27, 2048  }
  0x6f   : > { %2678 = vsyncadd (%p3429_p3), %s333_s27, 4294965248  ;;  %s341_s21 = sand.u32 1, %s2808_s9   ;;  %s2954_s23 = scalar_lea.vmem [#allocation4], %s1981_s25 }
  0x70   : > { %s342_s17 = scalar_lea.sflag [#allocation5], %s341_s21 }
  0x71   : > { %2680 = dma.done.wait (%p3429_p3), %s342_s17, 2048  }
  0x72   : > { %2682 = vsyncadd (%p3429_p3), %s342_s17, 4294965248  ;;  %p3430_p11 = scmp.eq.s32.totalorder %s2808_s9, 0 }
  0x74   : > { %2684 = dma.done.wait (%p3430_p11), [#allocation5], 1024   ;;  %p3431_p4 = pmov %p3430_p11 }
  0x75   : > { %v2397_v0 = vld [vmem:[%s3413_s2 + $0x38] sm:$0xff]   ;;  %v2398_v1 = vld [vmem:[%s3413_s2 + $0x30] sm:$0xff]   ;;  %v2399_v2 = vld [vmem:[%s3413_s2 + $0x28] sm:$0xff]   ;;  %s1984_s15 = sshll.u32 %s2943_s13, 8  ;;  %vm1546_vm0 = vcmask 31744   ;;  %p3432_p1 = scmp.ne.s32.totalorder %s3426_s16, 0 }
  0x76   : > { %2686 = vsyncadd (%p3431_p4), [#allocation5], 4294966272  ;;  %2122 = vmatprep.subr.bf16.mxu0 %v2397_v0  ;;  %2266 = vmatprep.subr.bf16.mxu1 %v2397_v0  ;;  %v2400_v3 = vld [vmem:[%s3413_s2 + $0x20] sm:$0xff]   ;;  %v2401_v10 = vld [vmem:[%s3413_s2 + $0x18] sm:$0xff]   ;;  %s3189_s13 = scalar_lea.vmem [#allocation7], %s1984_s15   ;;  %s2029_s19 = sshll.u32 (%p3432_p1), %s2808_s9, 5 }
  0x77   : > { %2123 = vmatpush3.bf16.msra.mxu0 %v2397_v0  ;;  %2274 = vmatpush3.bf16.msra.mxu1 %v2397_v0  ;;  %v402_v4 = vld [vmem:[%s2947_s30] sm:$0xf]  ;;  %v403_v5 = vld [vmem:[%s2947_s30 + $0x4] sm:$0xf]  ;;  %v2402_v12 = vld [vmem:[%s3413_s2 + $0x10] sm:$0xff]   ;;  %s2047_s22 = sshll.u32 (%p3432_p1), %s2808_s9, 8 }
  0x78   : > { %2124 = vmatprep.subr.bf16.mxu0 %v2398_v1  ;;  %2267 = vmatprep.subr.bf16.mxu1 %v2398_v1  ;;  %v434_v6 = vld [vmem:[%s2954_s23] sm:$0xf]  ;;  %v435_v7 = vld [vmem:[%s2954_s23 + $0x4] sm:$0xf]  ;;  %v2403_v17 = vld [vmem:[%s3413_s2 + $0x8] sm:$0xff]   ;;  %s1587_s12 = ssub.s32 (%p3432_p1), 79, %s2029_s19  ;;  %s3276_s24 = scalar_lea.vmem (%p3432_p1), %s3419_s8, %s2047_s22  }
  0x79   : > { %v466_v8 = vmul.bf16 %v434_v6, %v402_v4  ;;  %v467_v9 = vmul.bf16 %v435_v7, %v403_v5  ;;  %v418_v13 = vld [vmem:[%s2947_s30 + $0x40] sm:$0xf]  ;;  %v419_v14 = vld [vmem:[%s2947_s30 + $0x44] sm:$0xf]  ;;  %v404_v18 = vld [vmem:[%s2947_s30 + $0x8] sm:$0xf] }
  0x7a   : > { %v450_v15 = vld [vmem:[%s2954_s23 + $0x40] sm:$0xf]  ;;  %v451_v16 = vld [vmem:[%s2954_s23 + $0x44] sm:$0xf]  ;;  %v436_v19 = vld [vmem:[%s2954_s23 + $0x8] sm:$0xf] }
  0x7b   : > { %2125 = vmatpush3.bf16.msra.mxu0 %v2398_v1  ;;  %2275 = vmatpush3.bf16.msra.mxu1 %v2398_v1  ;;  %v1986_v11 = vcombine.low %v466_v8, %v467_v9  ;;  %v482_v20 = vmul.bf16 %v450_v15, %v418_v13  ;;  %v483_v21 = vmul.bf16 %v451_v16, %v419_v14  ;;  %v405_v22 = vld [vmem:[%s2947_s30 + $0xc] sm:$0xf]  ;;  %v406_v24 = vld [vmem:[%s2947_s30 + $0x10] sm:$0xf]  ;;  %v2404_v26 = vld [vmem:[%s3413_s2] sm:$0xff]   ;;  %p1588_p6 = scmp.lt.s32.totalorder (%p3432_p1), %s1587_s12, 32 }
  0x7c   : > { %2126 = vmatprep.subr.bf16.mxu0 %v2399_v2  ;;  %2268 = vmatprep.subr.bf16.mxu1 %v2399_v2  ;;  %v437_v23 = vld [vmem:[%s2954_s23 + $0xc] sm:$0xf]  ;;  %v438_v25 = vld [vmem:[%s2954_s23 + $0x10] sm:$0xf]  ;;  %v407_v27 = vld [vmem:[%s2947_s30 + $0x14] sm:$0xf]  ;;  %v468_v38 = vmul.bf16 %v436_v19, %v404_v18 }
  0x7d   : > { %2138 = vmatprep.mubr.bf16.mxu0 %v1986_v11  ;;  %v439_v28 = vld [vmem:[%s2954_s23 + $0x14] sm:$0xf]  ;;  %v1994_v29 = vcombine.low %v482_v20, %v483_v21  ;;  %v420_v30 = vld [vmem:[%s2947_s30 + $0x48] sm:$0xf]  ;;  %v421_v31 = vld [vmem:[%s2947_s30 + $0x4c] sm:$0xf]  ;;  %v469_v39 = vmul.bf16 %v437_v23, %v405_v22  ;;  %v470_v40 = vmul.bf16 %v438_v25, %v406_v24 }
  0x7e   : > { %v452_v32 = vld [vmem:[%s2954_s23 + $0x48] sm:$0xf]  ;;  %v453_v33 = vld [vmem:[%s2954_s23 + $0x4c] sm:$0xf]  ;;  %v422_v34 = vld [vmem:[%s2947_s30 + $0x50] sm:$0xf]  ;;  %v471_v43 = vmul.bf16 %v439_v28, %v407_v27 }
  0x7f   : > { %2127 = vmatpush3.bf16.msra.mxu0 %v2399_v2  ;;  %2276 = vmatpush3.bf16.msra.mxu1 %v2399_v2  ;;  %v423_v35 = vld [vmem:[%s2947_s30 + $0x54] sm:$0xf]  ;;  %v454_v36 = vld [vmem:[%s2954_s23 + $0x50] sm:$0xf]  ;;  %v484_v41 = vmul.bf16 %v452_v32, %v420_v30  ;;  %v485_v42 = vmul.bf16 %v453_v33, %v421_v31  ;;  %v408_v46 = vld [vmem:[%s2947_s30 + $0x18] sm:$0xf]  ;;  %v1987_v56 = vcombine.low %v468_v38, %v469_v39 }
  0x80   : > { %2128 = vmatprep.subr.bf16.mxu0 %v2400_v3  ;;  %2269 = vmatprep.subr.bf16.mxu1 %v2400_v3  ;;  %v455_v37 = vld [vmem:[%s2954_s23 + $0x54] sm:$0xf]  ;;  %v486_v44 = vmul.bf16 %v454_v36, %v422_v34  ;;  %v409_v47 = vld [vmem:[%s2947_s30 + $0x1c] sm:$0xf]  ;;  %v440_v48 = vld [vmem:[%s2954_s23 + $0x18] sm:$0xf]  ;;  %v1988_v63 = vcombine.low %v470_v40, %v471_v43 }
  0x81   : > { %2154 = vmatprep.mubr.bf16.mxu1 %v1994_v29  ;;  %v487_v45 = vmul.bf16 %v455_v37, %v423_v35  ;;  %v441_v49 = vld [vmem:[%s2954_s23 + $0x1c] sm:$0xf]  ;;  %v410_v50 = vld [vmem:[%s2947_s30 + $0x20] sm:$0xf]  ;;  %v424_v52 = vld [vmem:[%s2947_s30 + $0x58] sm:$0xf]  ;;  %v1995_v59 = vcombine.low %v484_v41, %v485_v42 }
  0x82   : > { %v442_v51 = vld [vmem:[%s2954_s23 + $0x20] sm:$0xf]  ;;  %v425_v53 = vld [vmem:[%s2947_s30 + $0x5c] sm:$0xf]  ;;  %v456_v54 = vld [vmem:[%s2954_s23 + $0x58] sm:$0xf]  ;;  %v473_v4 = vmul.bf16 %v441_v49, %v409_v47 }
  0x83   : > { %2129 = vmatpush3.bf16.msra.mxu0 %v2400_v3  ;;  %2277 = vmatpush3.bf16.msra.mxu1 %v2400_v3  ;;  %v457_v55 = vld [vmem:[%s2954_s23 + $0x5c] sm:$0xf]  ;;  %v411_v57 = vld [vmem:[%s2947_s30 + $0x24] sm:$0xf]  ;;  %v426_v60 = vld [vmem:[%s2947_s30 + $0x60] sm:$0xf]  ;;  %v1996_v0 = vcombine.low %v486_v44, %v487_v45  ;;  %v472_v3 = vmul.bf16 %v440_v48, %v408_v46  ;;  %v474_v6 = vmul.bf16 %v442_v51, %v410_v50 }
  0x84   : > { %2130 = vmatprep.subr.bf16.mxu0 %v2401_v10  ;;  %2270 = vmatprep.subr.bf16.mxu1 %v2401_v10  ;;  %v443_v58 = vld [vmem:[%s2954_s23 + $0x24] sm:$0xf]  ;;  %v2405_v62 = vld [vmem:[#allocation6 + $0x38] sm:$0xff]   ;;  %v458_v1 = vld [vmem:[%s2954_s23 + $0x60] sm:$0xf]  ;;  %v488_v7 = vmul.bf16 %v456_v54, %v424_v52  ;;  %v489_v8 = vmul.bf16 %v457_v55, %v425_v53 }
  0x85   : > { %v427_v61 = vld [vmem:[%s2947_s30 + $0x64] sm:$0xf]  ;;  %v2406_v5 = vld [vmem:[#allocation6 + $0x30] sm:$0xff]   ;;  %v475_v9 = vmul.bf16 %v443_v58, %v411_v57  ;;  %v412_v13 = vld [vmem:[%s2947_s30 + $0x28] sm:$0xf]  ;;  %v1989_v23 = vcombine.low %v472_v3, %v473_v4 }
  0x86   : > { %v459_v2 = vld [vmem:[%s2954_s23 + $0x64] sm:$0xf]  ;;  %v413_v14 = vld [vmem:[%s2947_s30 + $0x2c] sm:$0xf]  ;;  %v444_v15 = vld [vmem:[%s2954_s23 + $0x28] sm:$0xf] }
  0x87   : > { %2131 = vmatpush3.bf16.msra.mxu0 %v2401_v10  ;;  %2278 = vmatpush3.bf16.msra.mxu1 %v2401_v10  ;;  %v490_v10 = vmul.bf16 %v458_v1, %v426_v60  ;;  %v491_v11 = vmul.bf16 %v459_v2, %v427_v61  ;;  %v445_v16 = vld [vmem:[%s2954_s23 + $0x2c] sm:$0xf]  ;;  %v446_v18 = vld [vmem:[%s2954_s23 + $0x30] sm:$0xf]  ;;  %v428_v19 = vld [vmem:[%s2947_s30 + $0x68] sm:$0xf]  ;;  %v1990_v31 = vcombine.low %v474_v6, %v475_v9 }
  0x88   : > { %2132 = vmatprep.subr.bf16.mxu0 %v2402_v12  ;;  %2271 = vmatprep.subr.bf16.mxu1 %v2402_v12  ;;  %v429_v20 = vld [vmem:[%s2947_s30 + $0x6c] sm:$0xf]  ;;  %v460_v21 = vld [vmem:[%s2954_s23 + $0x68] sm:$0xf]  ;;  %v415_v24 = vld [vmem:[%s2947_s30 + $0x34] sm:$0xf]  ;;  %v476_v33 = vmul.bf16 %v444_v15, %v412_v13  ;;  %v477_v34 = vmul.bf16 %v445_v16, %v413_v14 }
  0x89   : > { %v461_v22 = vld [vmem:[%s2954_s23 + $0x6c] sm:$0xf]  ;;  %v447_v25 = vld [vmem:[%s2954_s23 + $0x34] sm:$0xf]  ;;  %v430_v27 = vld [vmem:[%s2947_s30 + $0x70] sm:$0xf]  ;;  %v1998_v32 = vcombine.low %v490_v10, %v491_v11  ;;  %v492_v37 = vmul.bf16 %v460_v21, %v428_v19 }
  0x8a   : > { %v431_v28 = vld [vmem:[%s2947_s30 + $0x74] sm:$0xf]  ;;  %v462_v29 = vld [vmem:[%s2954_s23 + $0x70] sm:$0xf]  ;;  %v2408_v35 = vld [vmem:[#allocation6 + $0x20] sm:$0xff]   ;;  %v493_v38 = vmul.bf16 %v461_v22, %v429_v20  ;;  %v479_v39 = vmul.bf16 %v447_v25, %v415_v24  ;;  %v1991_v45 = vcombine.low %v476_v33, %v477_v34 }
  0x8b   : > { %2133 = vmatpush3.bf16.msra.mxu0 %v2402_v12  ;;  %2279 = vmatpush3.bf16.msra.mxu1 %v2402_v12  ;;  %v2407_v12 = vld [vmem:[#allocation6 + $0x28] sm:$0xff]   ;;  %v463_v30 = vld [vmem:[%s2954_s23 + $0x74] sm:$0xf]  ;;  %v494_v40 = vmul.bf16 %v462_v29, %v430_v27  ;;  %v416_v42 = vld [vmem:[%s2947_s30 + $0x38] sm:$0xf] }
  0x8c   : > { %2134 = vmatprep.subr.bf16.mxu0 %v2403_v17  ;;  %2272 = vmatprep.subr.bf16.mxu1 %v2403_v17  ;;  %v495_v41 = vmul.bf16 %v463_v30, %v431_v28  ;;  %v417_v43 = vld [vmem:[%s2947_s30 + $0x3c] sm:$0xf]  ;;  %v448_v46 = vld [vmem:[%s2954_s23 + $0x38] sm:$0xf]  ;;  %v1999_v48 = vcombine.low %v492_v37, %v493_v38  ;;  %v2410_v61 = vld [vmem:[#allocation6 + $0x10] sm:$0xff]  }
  0x8d   : > { %v2409_v44 = vld [vmem:[#allocation6 + $0x18] sm:$0xff]   ;;  %v480_v55 = vmul.bf16 %v448_v46, %v416_v42  ;;  %v2414_v1 = vld [vmem:[%s3417_s6 + $0x30] sm:$0xff]   ;;  %v2415_v2 = vld [vmem:[%s3417_s6 + $0x28] sm:$0xff]  }
  0x8e   : > { %v449_v47 = vld [vmem:[%s2954_s23 + $0x3c] sm:$0xf]  ;;  %v432_v49 = vld [vmem:[%s2947_s30 + $0x78] sm:$0xf]  ;;  %v2000_v51 = vcombine.low %v494_v40, %v495_v41  ;;  %v2416_v3 = vld [vmem:[%s3417_s6 + $0x20] sm:$0xff]  }
  0x8f   : > { %2135 = vmatpush3.bf16.msra.mxu0 %v2403_v17  ;;  %2280 = vmatpush3.bf16.msra.mxu1 %v2403_v17  ;;  %v414_v17 = vld [vmem:[%s2947_s30 + $0x30] sm:$0xf]  ;;  %v433_v52 = vld [vmem:[%s2947_s30 + $0x7c] sm:$0xf]  ;;  %v464_v53 = vld [vmem:[%s2954_s23 + $0x78] sm:$0xf] }
  0x90   : > { %2136 = vmatprep.subr.bf16.mxu0 %v2404_v26  ;;  %2273 = vmatprep.subr.bf16.mxu1 %v2404_v26  ;;  %v478_v36 = vmul.bf16 %v446_v18, %v414_v17  ;;  %v465_v54 = vld [vmem:[%s2954_s23 + $0x7c] sm:$0xf]  ;;  %v496_v57 = vmul.bf16 %v464_v53, %v432_v49  ;;  %v3072_v9 = vld [vmem:[%s3414_s3] ss:$0 sm:$0xff] }
  0x91   : > { %v497_v58 = vmul.bf16 %v465_v54, %v433_v52  ;;  %v2417_v4 = vld [vmem:[%s3417_s6 + $0x18] sm:$0xff]  }
  0x92   : > { %v1992_v50 = vcombine.low %v478_v36, %v479_v39 }
  0x93   : > { %2137 = vmatpush3.bf16.msra.mxu0 %v2404_v26  ;;  %2281 = vmatpush3.bf16.msra.mxu1 %v2404_v26  ;;  %v1997_v26 = vcombine.low %v488_v7, %v489_v8  ;;  %v2001_v60 = vcombine.low %v496_v57, %v497_v58 }
  0x94   : > { %2170 = vmatprep.subr.bf16.mxu1 %v2405_v62 }
  0x96   : > { %2139 = vmatmul.mubr.bf16.vlgmr.msra.gmra.mxu0 %v1987_v56  ;;  %2155 = vmatmul.mubr.bf16.vlgmr.msra.gmra.mxu1 %v1995_v59  ;;  %v481_v56 = vmul.bf16 %v449_v47, %v417_v43 }
  0x97   : > { %2142 = vmatprep.mubr.bf16.mxu0 %v1988_v63  ;;  %2158 = vmatprep.mubr.bf16.mxu1 %v1996_v0  ;;  %v2412_v63 = vld [vmem:[#allocation6] sm:$0xff]   ;;  %v2413_v0 = vld [vmem:[%s3417_s6 + $0x38] sm:$0xff]  }
  0x98   : > { %2171 = vmatpush3.bf16.msra.mxu1 %v2405_v62  ;;  %v1993_v59 = vcombine.low %v480_v55, %v481_v56  ;;  %v2411_v62 = vld [vmem:[#allocation6 + $0x8] sm:$0xff]   ;;  %2218 = vmatprep.subr.bf16.mxu0 %v2413_v0 }
  0x99   : > { %2172 = vmatprep.subr.bf16.mxu1 %v2406_v5  ;;  %2219 = vmatpush3.bf16.msra.mxu0 %v2413_v0 }
  0x9a   : > { %2220 = vmatprep.subr.bf16.mxu0 %v2414_v1 }
  0x9c   : > { %2173 = vmatpush3.bf16.msra.mxu1 %v2406_v5 }
  0x9d   : > { %2174 = vmatprep.subr.bf16.mxu1 %v2407_v12  ;;  %2221 = vmatpush3.bf16.msra.mxu0 %v2414_v1 }
  0x9e   : > { %2143 = vmatmul.mubr.bf16.gmra.mxu0 %v1989_v23  ;;  %2159 = vmatmul.mubr.bf16.gmra.mxu1 %v1997_v26 }
  0x9f   : > { %2146 = vmatprep.mubr.bf16.mxu0 %v1990_v31  ;;  %2162 = vmatprep.mubr.bf16.mxu1 %v1998_v32 }
  0xa0   : > { %2175 = vmatpush3.bf16.msra.mxu1 %v2407_v12  ;;  %2222 = vmatprep.subr.bf16.mxu0 %v2415_v2 }
  0xa1   : > { %2176 = vmatprep.subr.bf16.mxu1 %v2408_v35  ;;  %2223 = vmatpush3.bf16.msra.mxu0 %v2415_v2 }
  0xa2   : > { %2224 = vmatprep.subr.bf16.mxu0 %v2416_v3 }
  0xa4   : > { %2177 = vmatpush3.bf16.msra.mxu1 %v2408_v35 }
  0xa5   : > { %2178 = vmatprep.subr.bf16.mxu1 %v2409_v44  ;;  %2225 = vmatpush3.bf16.msra.mxu0 %v2416_v3 }
  0xa6   : > { %2147 = vmatmul.mubr.bf16.gmra.mxu0 %v1991_v45  ;;  %2163 = vmatmul.mubr.bf16.gmra.mxu1 %v1999_v48 }
  0xa7   : > { %2150 = vmatprep.mubr.bf16.mxu0 %v1992_v50  ;;  %2166 = vmatprep.mubr.bf16.mxu1 %v2000_v51 }
  0xa8   : > { %2179 = vmatpush3.bf16.msra.mxu1 %v2409_v44  ;;  %2226 = vmatprep.subr.bf16.mxu0 %v2417_v4 }
  0xa9   : > { %2180 = vmatprep.subr.bf16.mxu1 %v2410_v61  ;;  %2227 = vmatpush3.bf16.msra.mxu0 %v2417_v4 }
  0xac   : > { %2181 = vmatpush3.bf16.msra.mxu1 %v2410_v61 }
  0xad   : > { %2182 = vmatprep.subr.bf16.mxu1 %v2411_v62 }
  0xae   : > { %2151 = vmatmul.mubr.bf16.gmra.mxu0 %v1993_v59  ;;  %2167 = vmatmul.mubr.bf16.gmra.mxu1 %v2001_v60 }
  0xb0   : > { %2183 = vmatpush3.bf16.msra.mxu1 %v2411_v62 }
  0xb1   : > { %2184 = vmatprep.subr.bf16.mxu1 %v2412_v63 }
  0xb4   : > { %2185 = vmatpush3.bf16.msra.mxu1 %v2412_v63 }
 0x156   : > { %v2140_v5 = vpop.f32.mrf.mxu0  ;;  %v3067_v6 = vpop.f32.mrf.mxu1 }
 0x157   : > { %v708_v14 = vadd.f32 %v2140_v5, %v3072_v9 }
 0x158   : > { %v699_v7 = vpop.f32.mrf.mxu0  ;;  %v763_v8 = vpop.f32.mrf.mxu1 }
 0x159   : > { %v700_v12 = vadd.f32 %v3072_v9, %v699_v7  ;;  %v828_v23 = vmax.f32 %v708_v14, 0.0  ;;  %v764_v59 = vadd.f32 %v3072_v9, %v763_v8 }
 0x15a   : > { %v2141_v10 = vpop.f32.mrf.mxu0  ;;  %v3074_v11 = vpop.f32.mrf.mxu1 }
 0x15b   : > { %v711_v13 = vadd.f32 %v2141_v10, %v3072_v9  ;;  %v826_v21 = vmax.f32 %v700_v12, 0.0  ;;  %v842_v4 = vmax.f32 %v764_v59, 0.0  ;;  %v3131_v59 = vld [vmem:[%s3416_s5] ss:$0 sm:$0xff] }
 0x15c   : > { %v702_v15 = vpop.f32.mrf.mxu0  ;;  %v766_v16 = vpop.f32.mrf.mxu1 }
 0x15d   : > { %v703_v17 = vadd.f32 %v3072_v9, %v702_v15  ;;  %v829_v18 = vmax.f32 %v711_v13, 0.0  ;;  %v767_v60 = vadd.f32 %v3072_v9, %v766_v16 }
 0x15e   : > { %v2144_v19 = vpop.f32.mrf.mxu0  ;;  %v3080_v20 = vpop.f32.mrf.mxu1 }
 0x15f   : > { %v827_v22 = vmax.f32 %v703_v17, 0.0  ;;  %v859_v27 = vpack.c.bf16 %v829_v18, %v828_v23  ;;  %v724_v32 = vadd.f32 %v2144_v19, %v3072_v9  ;;  %v843_v7 = vmax.f32 %v767_v60, 0.0 }
 0x160   : > { %v715_v24 = vpop.f32.mrf.mxu0  ;;  %v779_v25 = vpop.f32.mrf.mxu1  ;;  %v772_v19 = vadd.f32 %v3067_v6, %v3072_v9  ;;  %v788_v6 = vadd.f32 %v3080_v20, %v3072_v9 }
 0x161   : > { %v858_v26 = vpack.c.bf16 %v827_v22, %v826_v21  ;;  %v716_v30 = vadd.f32 %v3072_v9, %v715_v24  ;;  %v832_v40 = vmax.f32 %v724_v32, 0.0  ;;  %v866_v16 = vpack.c.bf16 %v843_v7, %v842_v4 }
 0x162   : > { %v2145_v28 = vpop.f32.mrf.mxu0  ;;  %v3082_v29 = vpop.f32.mrf.mxu1  ;;  %v780_v17 = vadd.f32 %v3072_v9, %v779_v25  ;;  %v775_v22 = vadd.f32 %v3074_v11, %v3072_v9 }
 0x163   : > { %v727_v31 = vadd.f32 %v2145_v28, %v3072_v9  ;;  %2186 = vmatprep.mubr.bf16.mxu1 %v858_v26  ;;  %v830_v38 = vmax.f32 %v716_v30, 0.0  ;;  %v791_v11 = vadd.f32 %v3082_v29, %v3072_v9 }
 0x164   : > { %v718_v33 = vpop.f32.mrf.mxu0  ;;  %2187 = vmatmul.mubr.bf16.vlgmr.msra.gmra.mxu1 %v859_v27  ;;  %v782_v37 = vpop.f32.mrf.mxu1  ;;  %v846_v24 = vmax.f32 %v780_v17, 0.0  ;;  %v844_v27 = vmax.f32 %v772_v19, 0.0  ;;  %v845_v28 = vmax.f32 %v775_v22, 0.0 }
 0x165   : > { %v719_v34 = vadd.f32 %v3072_v9, %v718_v33  ;;  %v833_v35 = vmax.f32 %v727_v31, 0.0  ;;  %v783_v18 = vadd.f32 %v3072_v9, %v782_v37  ;;  %v848_v37 = vmax.f32 %v788_v6, 0.0 }
 0x166   : > { %v2148_v36 = vpop.f32.mrf.mxu0  ;;  %v3088_v45 = vpop.f32.mrf.mxu1  ;;  %v867_v33 = vpack.c.bf16 %v845_v28, %v844_v27 }
 0x167   : > { %v831_v39 = vmax.f32 %v719_v34, 0.0  ;;  %v861_v43 = vpack.c.bf16 %v833_v35, %v832_v40  ;;  %v740_v48 = vadd.f32 %v2148_v36, %v3072_v9  ;;  %v847_v26 = vmax.f32 %v783_v18, 0.0 }
 0x168   : > { %v731_v41 = vpop.f32.mrf.mxu0  ;;  %v795_v53 = vpop.f32.mrf.mxu1  ;;  %v804_v20 = vadd.f32 %v3088_v45, %v3072_v9  ;;  %v2418_v45 = vld [vmem:[%s3417_s6 + $0x10] sm:$0xff]  }
 0x169   : > { %v860_v42 = vpack.c.bf16 %v831_v39, %v830_v38  ;;  %v732_v46 = vadd.f32 %v3072_v9, %v731_v41  ;;  %v836_v56 = vmax.f32 %v740_v48, 0.0  ;;  %v868_v31 = vpack.c.bf16 %v847_v26, %v846_v24  ;;  %2228 = vmatprep.subr.bf16.mxu0 %v2418_v45 }
 0x16a   : > { %v2149_v44 = vpop.f32.mrf.mxu0  ;;  %v2165_v63 = vpop.f32.mrf.mxu1  ;;  %v796_v25 = vadd.f32 %v3072_v9, %v795_v53  ;;  %v849_v38 = vmax.f32 %v791_v11, 0.0  ;;  %2229 = vmatpush3.bf16.msra.mxu0 %v2418_v45 }
 0x16b   : > { %v743_v47 = vadd.f32 %v2149_v44, %v3072_v9  ;;  %2190 = vmatprep.mubr.bf16.mxu1 %v860_v42  ;;  %v834_v54 = vmax.f32 %v732_v46, 0.0  ;;  %v807_v44 = vadd.f32 %v2165_v63, %v3072_v9 }
 0x16c   : > { %v734_v49 = vpop.f32.mrf.mxu0  ;;  %2191 = vmatmul.mubr.bf16.gmra.mxu1 %v861_v43  ;;  %v798_v8 = vpop.f32.mrf.mxu1  ;;  %v850_v35 = vmax.f32 %v796_v25, 0.0  ;;  %v869_v43 = vpack.c.bf16 %v849_v38, %v848_v37 }
 0x16d   : > { %v735_v50 = vadd.f32 %v3072_v9, %v734_v49  ;;  %v837_v51 = vmax.f32 %v743_v47, 0.0  ;;  %v799_v32 = vadd.f32 %v3072_v9, %v798_v8  ;;  %v852_v47 = vmax.f32 %v804_v20, 0.0 }
 0x16e   : > { %v2152_v52 = vpop.f32.mrf.mxu0  ;;  %v2168_v23 = vpop.f32.mrf.mxu1  ;;  %v853_v48 = vmax.f32 %v807_v44, 0.0 }
 0x16f   : > { %v835_v55 = vmax.f32 %v735_v50, 0.0  ;;  %v863_v61 = vpack.c.bf16 %v837_v51, %v836_v56  ;;  %v756_v2 = vadd.f32 %v2152_v52, %v3072_v9  ;;  %v851_v36 = vmax.f32 %v799_v32, 0.0  ;;  %v2419_v56 = vld [vmem:[%s3417_s6 + $0x8] sm:$0xff]  }
 0x170   : > { %v747_v57 = vpop.f32.mrf.mxu0  ;;  %v811_v30 = vpop.f32.mrf.mxu1  ;;  %v871_v50 = vpack.c.bf16 %v853_v48, %v852_v47  ;;  %v820_v51 = vadd.f32 %v2168_v23, %v3072_v9  ;;  %2230 = vmatprep.subr.bf16.mxu0 %v2419_v56 }
 0x171   : > { %v862_v58 = vpack.c.bf16 %v835_v55, %v834_v54  ;;  %v748_v0 = vadd.f32 %v3072_v9, %v747_v57  ;;  %v840_v14 = vmax.f32 %v756_v2, 0.0  ;;  %v870_v40 = vpack.c.bf16 %v851_v36, %v850_v35  ;;  %2231 = vmatpush3.bf16.msra.mxu0 %v2419_v56 }
 0x172   : > { %v2153_v62 = vpop.f32.mrf.mxu0  ;;  %v2169_v34 = vpop.f32.mrf.mxu1  ;;  %v812_v41 = vadd.f32 %v3072_v9, %v811_v30  ;;  %v856_v53 = vmax.f32 %v820_v51, 0.0 }
 0x173   : > { %v759_v1 = vadd.f32 %v2153_v62, %v3072_v9  ;;  %2194 = vmatprep.mubr.bf16.mxu1 %v862_v58  ;;  %v838_v12 = vmax.f32 %v748_v0, 0.0  ;;  %v823_v52 = vadd.f32 %v2169_v34, %v3072_v9 }
 0x174   : > { %v750_v3 = vpop.f32.mrf.mxu0  ;;  %2195 = vmatmul.mubr.bf16.gmra.mxu1 %v863_v61  ;;  %v814_v39 = vpop.f32.mrf.mxu1  ;;  %v854_v29 = vmax.f32 %v812_v41, 0.0 }
 0x175   : > { %v751_v5 = vadd.f32 %v3072_v9, %v750_v3  ;;  %v841_v10 = vmax.f32 %v759_v1, 0.0  ;;  %v815_v42 = vadd.f32 %v3072_v9, %v814_v39  ;;  %v857_v54 = vmax.f32 %v823_v52, 0.0  ;;  %v2420_v9 = vld [vmem:[%s3417_s6] sm:$0xff]  }
 0x176   : > { %2232 = vmatprep.subr.bf16.mxu0 %v2420_v9 }
 0x177   : > { %v839_v13 = vmax.f32 %v751_v5, 0.0  ;;  %v865_v21 = vpack.c.bf16 %v841_v10, %v840_v14  ;;  %v855_v46 = vmax.f32 %v815_v42, 0.0  ;;  %v873_v55 = vpack.c.bf16 %v857_v54, %v856_v53  ;;  %2233 = vmatpush3.bf16.msra.mxu0 %v2420_v9 }
 0x179   : > { %v864_v15 = vpack.c.bf16 %v839_v13, %v838_v12  ;;  %v872_v49 = vpack.c.bf16 %v855_v46, %v854_v29 }
 0x17b   : > { %2198 = vmatprep.mubr.bf16.mxu1 %v864_v15 }
 0x17c   : > { %2199 = vmatmul.mubr.bf16.gmra.mxu1 %v865_v21 }
 0x17d   : > { %2202 = vmatprep.mubr.bf16.mxu1 %v866_v16 }
 0x184   : > { %2203 = vmatmul.mubr.bf16.gmra.mxu1 %v867_v33 }
 0x185   : > { %2206 = vmatprep.mubr.bf16.mxu1 %v868_v31 }
 0x18c   : > { %2207 = vmatmul.mubr.bf16.gmra.mxu1 %v869_v43 }
 0x18d   : > { %2210 = vmatprep.mubr.bf16.mxu1 %v870_v40 }
 0x194   : > { %2211 = vmatmul.mubr.bf16.gmra.mxu1 %v871_v50 }
 0x195   : > { %2214 = vmatprep.mubr.bf16.mxu1 %v872_v49 }
 0x19c   : > { %2215 = vmatmul.mubr.bf16.gmra.mxu1 %v873_v55 }
 0x224   : > { %v2188_v57 = vpop.f32.mrf.mxu1 }
 0x225   : > { %v988_v63 = vadd.f32 %v2188_v57, %v3131_v59 }
 0x226   : > { %v979_v58 = vpop.f32.mrf.mxu1 }
 0x227   : > { %v980_v61 = vadd.f32 %v3131_v59, %v979_v58  ;;  %v1108_v7 = vmax.f32 %v988_v63, 0.0 }
 0x228   : > { %v2189_v60 = vpop.f32.mrf.mxu1 }
 0x229   : > { %v991_v62 = vadd.f32 %v2189_v60, %v3131_v59  ;;  %v1106_v4 = vmax.f32 %v980_v61, 0.0 }
 0x22a   : > { %v982_v0 = vpop.f32.mrf.mxu1 }
 0x22b   : > { %v983_v1 = vadd.f32 %v3131_v59, %v982_v0  ;;  %v1109_v2 = vmax.f32 %v991_v62, 0.0 }
 0x22c   : > { %v2192_v3 = vpop.f32.mrf.mxu1 }
 0x22d   : > { %v1107_v5 = vmax.f32 %v983_v1, 0.0  ;;  %v1139_v12 = vpack.c.bf16 %v1109_v2, %v1108_v7  ;;  %v1004_v16 = vadd.f32 %v2192_v3, %v3131_v59 }
 0x22e   : > { %v995_v10 = vpop.f32.mrf.mxu1 }
 0x22f   : > { %v1138_v8 = vpack.c.bf16 %v1107_v5, %v1106_v4  ;;  %v996_v14 = vadd.f32 %v3131_v59, %v995_v10  ;;  %v1112_v24 = vmax.f32 %v1004_v16, 0.0 }
 0x230   : > { %v2193_v13 = vpop.f32.mrf.mxu1 }
 0x231   : > { %v1007_v15 = vadd.f32 %v2193_v13, %v3131_v59  ;;  %2234 = vmatprep.mubr.bf16.mxu0 %v1138_v8  ;;  %v1110_v22 = vmax.f32 %v996_v14, 0.0 }
 0x232   : > { %v998_v17 = vpop.f32.mrf.mxu1  ;;  %2235 = vmatmul.mubr.bf16.vlgmr.msra.gmra.mxu0 %v1139_v12 }
 0x233   : > { %v999_v18 = vadd.f32 %v3131_v59, %v998_v17  ;;  %v1113_v19 = vmax.f32 %v1007_v15, 0.0 }
 0x234   : > { %v2196_v21 = vpop.f32.mrf.mxu1 }
 0x235   : > { %v1111_v23 = vmax.f32 %v999_v18, 0.0  ;;  %v1141_v28 = vpack.c.bf16 %v1113_v19, %v1112_v24  ;;  %v1020_v32 = vadd.f32 %v2196_v21, %v3131_v59 }
 0x236   : > { %v1011_v26 = vpop.f32.mrf.mxu1 }
 0x237   : > { %v1140_v27 = vpack.c.bf16 %v1111_v23, %v1110_v22  ;;  %v1012_v31 = vadd.f32 %v3131_v59, %v1011_v26  ;;  %v1116_v37 = vmax.f32 %v1020_v32, 0.0 }
 0x238   : > { %v2197_v30 = vpop.f32.mrf.mxu1 }
 0x239   : > { %v1023_v25 = vadd.f32 %v2197_v30, %v3131_v59  ;;  %2238 = vmatprep.mubr.bf16.mxu0 %v1140_v27  ;;  %v1114_v35 = vmax.f32 %v1012_v31, 0.0 }
 0x23a   : > { %v1014_v33 = vpop.f32.mrf.mxu1  ;;  %2239 = vmatmul.mubr.bf16.gmra.mxu0 %v1141_v28 }
 0x23b   : > { %v1015_v6 = vadd.f32 %v3131_v59, %v1014_v33  ;;  %v1117_v11 = vmax.f32 %v1023_v25, 0.0 }
 0x23c   : > { %v2200_v34 = vpop.f32.mrf.mxu1 }
 0x23d   : > { %v1115_v36 = vmax.f32 %v1015_v6, 0.0  ;;  %v1143_v40 = vpack.c.bf16 %v1117_v11, %v1116_v37  ;;  %v1036_v20 = vadd.f32 %v2200_v34, %v3131_v59 }
 0x23e   : > { %v1027_v38 = vpop.f32.mrf.mxu1 }
 0x23f   : > { %v1142_v39 = vpack.c.bf16 %v1115_v36, %v1114_v35  ;;  %v1028_v42 = vadd.f32 %v3131_v59, %v1027_v38  ;;  %v1120_v50 = vmax.f32 %v1036_v20, 0.0 }
 0x240   : > { %v2201_v41 = vpop.f32.mrf.mxu1 }
 0x241   : > { %v1039_v43 = vadd.f32 %v2201_v41, %v3131_v59  ;;  %2242 = vmatprep.mubr.bf16.mxu0 %v1142_v39  ;;  %v1118_v48 = vmax.f32 %v1028_v42, 0.0 }
 0x242   : > { %v1030_v44 = vpop.f32.mrf.mxu1  ;;  %2243 = vmatmul.mubr.bf16.gmra.mxu0 %v1143_v40 }
 0x243   : > { %v1031_v29 = vadd.f32 %v3131_v59, %v1030_v44  ;;  %v1121_v46 = vmax.f32 %v1039_v43, 0.0 }
 0x244   : > { %v2204_v47 = vpop.f32.mrf.mxu1 }
 0x245   : > { %v1119_v49 = vmax.f32 %v1031_v29, 0.0  ;;  %v1145_v53 = vpack.c.bf16 %v1121_v46, %v1120_v50  ;;  %v1052_v56 = vadd.f32 %v2204_v47, %v3131_v59  ;;  %v3168_v29 = vld [vmem:[%s3418_s7] ss:$0 sm:$0xff] }
 0x246   : > { %v1043_v51 = vpop.f32.mrf.mxu1 }
 0x247   : > { %v1144_v52 = vpack.c.bf16 %v1119_v49, %v1118_v48  ;;  %v1044_v55 = vadd.f32 %v3131_v59, %v1043_v51  ;;  %v1124_v63 = vmax.f32 %v1052_v56, 0.0 }
 0x248   : > { %v2205_v54 = vpop.f32.mrf.mxu1 }
 0x249   : > { %v1055_v45 = vadd.f32 %v2205_v54, %v3131_v59  ;;  %2246 = vmatprep.mubr.bf16.mxu0 %v1144_v52  ;;  %v1122_v61 = vmax.f32 %v1044_v55, 0.0 }
 0x24a   : > { %v1046_v9 = vpop.f32.mrf.mxu1  ;;  %2247 = vmatmul.mubr.bf16.gmra.mxu0 %v1145_v53 }
 0x24b   : > { %v1047_v57 = vadd.f32 %v3131_v59, %v1046_v9  ;;  %v1125_v58 = vmax.f32 %v1055_v45, 0.0 }
 0x24c   : > { %v2208_v60 = vpop.f32.mrf.mxu1 }
 0x24d   : > { %v1123_v62 = vmax.f32 %v1047_v57, 0.0  ;;  %v1147_v2 = vpack.c.bf16 %v1125_v58, %v1124_v63  ;;  %v1068_v7 = vadd.f32 %v2208_v60, %v3131_v59 }
 0x24e   : > { %v1059_v0 = vpop.f32.mrf.mxu1 }
 0x24f   : > { %v1146_v1 = vpack.c.bf16 %v1123_v62, %v1122_v61  ;;  %v1060_v4 = vadd.f32 %v3131_v59, %v1059_v0  ;;  %v1128_v16 = vmax.f32 %v1068_v7, 0.0 }
 0x250   : > { %v2209_v3 = vpop.f32.mrf.mxu1 }
 0x251   : > { %v1071_v5 = vadd.f32 %v2209_v3, %v3131_v59  ;;  %2250 = vmatprep.mubr.bf16.mxu0 %v1146_v1  ;;  %v1126_v14 = vmax.f32 %v1060_v4, 0.0 }
 0x252   : > { %v1062_v10 = vpop.f32.mrf.mxu1  ;;  %2251 = vmatmul.mubr.bf16.gmra.mxu0 %v1147_v2 }
 0x253   : > { %v1063_v8 = vadd.f32 %v3131_v59, %v1062_v10  ;;  %v1129_v12 = vmax.f32 %v1071_v5, 0.0 }
 0x254   : > { %v2212_v13 = vpop.f32.mrf.mxu1 }
 0x255   : > { %v1127_v15 = vmax.f32 %v1063_v8, 0.0  ;;  %v1149_v19 = vpack.c.bf16 %v1129_v12, %v1128_v16  ;;  %v1084_v24 = vadd.f32 %v2212_v13, %v3131_v59 }
 0x256   : > { %v1075_v17 = vpop.f32.mrf.mxu1 }
 0x257   : > { %v1148_v18 = vpack.c.bf16 %v1127_v15, %v1126_v14  ;;  %v1076_v22 = vadd.f32 %v3131_v59, %v1075_v17  ;;  %v1132_v32 = vmax.f32 %v1084_v24, 0.0 }
 0x258   : > { %v2213_v21 = vpop.f32.mrf.mxu1 }
 0x259   : > { %v1087_v23 = vadd.f32 %v2213_v21, %v3131_v59  ;;  %2254 = vmatprep.mubr.bf16.mxu0 %v1148_v18  ;;  %v1130_v31 = vmax.f32 %v1076_v22, 0.0 }
 0x25a   : > { %v1078_v26 = vpop.f32.mrf.mxu1  ;;  %2255 = vmatmul.mubr.bf16.gmra.mxu0 %v1149_v19 }
 0x25b   : > { %v1079_v27 = vadd.f32 %v3131_v59, %v1078_v26  ;;  %v1133_v28 = vmax.f32 %v1087_v23, 0.0 }
 0x25c   : > { %v2216_v30 = vpop.f32.mrf.mxu1 }
 0x25d   : > { %v1131_v25 = vmax.f32 %v1079_v27, 0.0  ;;  %v1151_v11 = vpack.c.bf16 %v1133_v28, %v1132_v32  ;;  %v1100_v37 = vadd.f32 %v2216_v30, %v3131_v59 }
 0x25e   : > { %v1091_v33 = vpop.f32.mrf.mxu1 }
 0x25f   : > { %v1150_v6 = vpack.c.bf16 %v1131_v25, %v1130_v31  ;;  %v1092_v35 = vadd.f32 %v3131_v59, %v1091_v33  ;;  %v1136_v43 = vmax.f32 %v1100_v37, 0.0 }
 0x260   : > { %v2217_v34 = vpop.f32.mrf.mxu1 }
 0x261   : > { %v1103_v36 = vadd.f32 %v2217_v34, %v3131_v59  ;;  %2258 = vmatprep.mubr.bf16.mxu0 %v1150_v6  ;;  %v1134_v41 = vmax.f32 %v1092_v35, 0.0 }
 0x262   : > { %v1094_v38 = vpop.f32.mrf.mxu1  ;;  %2259 = vmatmul.mubr.bf16.gmra.mxu0 %v1151_v11 }
 0x263   : > { %v1095_v39 = vadd.f32 %v3131_v59, %v1094_v38  ;;  %v1137_v40 = vmax.f32 %v1103_v36, 0.0 }
 0x265   : > { %v1135_v42 = vmax.f32 %v1095_v39, 0.0  ;;  %v1153_v44 = vpack.c.bf16 %v1137_v40, %v1136_v43 }
 0x267   : > { %v1152_v20 = vpack.c.bf16 %v1135_v42, %v1134_v41 }
 0x269   : > { %2262 = vmatprep.mubr.bf16.mxu0 %v1152_v20 }
 0x26a   : > { %2263 = vmatmul.mubr.bf16.gmra.mxu0 %v1153_v44 }
 0x2f2   : > { %v2236_v46 = vpop.f32.mrf.mxu0 }
 0x2f3   : > { %v1268_v47 = vadd.f32 %v2236_v46, %v3168_v29 }
 0x2f4   : > { %v1259_v48 = vpop.f32.mrf.mxu0 }
 0x2f5   : > { %v1388_v49 = vsub.f32 0.0, %v1268_v47  ;;  %v1260_v59 = vadd.f32 %v3168_v29, %v1259_v48 }
 0x2f6   : > { %v2237_v50 = vpop.f32.mrf.mxu0 }
 0x2f7   : > { %v1422_v51 = vmul.f32 1.442695, %v1388_v49  ;;  %v1386_v52 = vsub.f32 0.0, %v1260_v59  ;;  %v1271_v53 = vadd.f32 %v2237_v50, %v3168_v29 }
 0x2f8   : > { %v1262_v54 = vpop.f32.mrf.mxu0 }
 0x2f9   : > { %2421 = vpow2.f32 %v1422_v51  ;;  %v1418_v55 = vmul.f32 1.442695, %v1386_v52  ;;  %v1389_v45 = vsub.f32 0.0, %v1271_v53  ;;  %v1263_v56 = vadd.f32 %v3168_v29, %v1262_v54 }
 0x2fa   : > { %v2240_v9 = vpop.f32.mrf.mxu0 }
 0x2fb   : > { %2423 = vpow2.f32 %v1418_v55  ;;  %v1424_v57 = vmul.f32 1.442695, %v1389_v45  ;;  %v1387_v58 = vsub.f32 0.0, %v1263_v56  ;;  %v1284_v60 = vadd.f32 %v2240_v9, %v3168_v29 }
 0x2fc   : > { %v1275_v61 = vpop.f32.mrf.mxu0 }
 0x2fd   : > { %2425 = vpow2.f32 %v1424_v57  ;;  %v1420_v62 = vmul.f32 1.442695, %v1387_v58  ;;  %v1392_v63 = vsub.f32 0.0, %v1284_v60  ;;  %v1276_v0 = vadd.f32 %v3168_v29, %v1275_v61 }
 0x2fe   : > { %v2241_v1 = vpop.f32.mrf.mxu0 }
 0x2ff   : > { %2427 = vpow2.f32 %v1420_v62  ;;  %v1430_v2 = vmul.f32 1.442695, %v1392_v63  ;;  %v1390_v3 = vsub.f32 0.0, %v1276_v0  ;;  %v1287_v4 = vadd.f32 %v2241_v1, %v3168_v29 }
 0x300   : > { %v1278_v5 = vpop.f32.mrf.mxu0 }
 0x301   : > { %2429 = vpow2.f32 %v1430_v2  ;;  %v1426_v7 = vmul.f32 1.442695, %v1390_v3  ;;  %v1393_v10 = vsub.f32 0.0, %v1287_v4  ;;  %v1279_v8 = vadd.f32 %v3168_v29, %v1278_v5 }
 0x302   : > { %v2244_v12 = vpop.f32.mrf.mxu0 }
 0x303   : > { %2431 = vpow2.f32 %v1426_v7  ;;  %v1432_v13 = vmul.f32 1.442695, %v1393_v10  ;;  %v1391_v14 = vsub.f32 0.0, %v1279_v8  ;;  %v1300_v15 = vadd.f32 %v2244_v12, %v3168_v29 }
 0x304   : > { %v1291_v16 = vpop.f32.mrf.mxu0 }
 0x305   : > { %2433 = vpow2.f32 %v1432_v13  ;;  %v1428_v17 = vmul.f32 1.442695, %v1391_v14  ;;  %v1396_v18 = vsub.f32 0.0, %v1300_v15  ;;  %v1292_v19 = vadd.f32 %v3168_v29, %v1291_v16 }
 0x306   : > { %v2422_v21 = vpop.eup %2421  ;;  %v2245_v22 = vpop.f32.mrf.mxu0 }
 0x307   : > { %v1484_v23 = vadd.f32 1.0, %v2422_v21  ;;  %2435 = vpow2.f32 %v1428_v17  ;;  %v1438_v24 = vmul.f32 1.442695, %v1396_v18  ;;  %v1394_v26 = vsub.f32 0.0, %v1292_v19 }
 0x308   : > { %v2424_v27 = vpop.eup %2423  ;;  %v1303_v28 = vadd.f32 %v2245_v22, %v3168_v29  ;;  %v1294_v30 = vpop.f32.mrf.mxu0 }
 0x309   : > { %2437 = vrcp.f32 %v1484_v23  ;;  %v1482_v31 = vadd.f32 1.0, %v2424_v27  ;;  %v1434_v25 = vmul.f32 1.442695, %v1394_v26  ;;  %v1295_v32 = vadd.f32 %v3168_v29, %v1294_v30 }
 0x30a   : > { %v2426_v33 = vpop.eup %2425  ;;  %2439 = vpow2.f32 %v1438_v24  ;;  %v1397_v6 = vsub.f32 0.0, %v1303_v28  ;;  %v2248_v11 = vpop.f32.mrf.mxu0 }
 0x30b   : > { %2441 = vrcp.f32 %v1482_v31  ;;  %v1485_v34 = vadd.f32 1.0, %v2426_v33  ;;  %v1395_v35 = vsub.f32 0.0, %v1295_v32  ;;  %v1316_v36 = vadd.f32 %v2248_v11, %v3168_v29 }
 0x30c   : > { %v2428_v37 = vpop.eup %2427  ;;  %2443 = vpow2.f32 %v1434_v25  ;;  %v1440_v38 = vmul.f32 1.442695, %v1397_v6  ;;  %v1307_v39 = vpop.f32.mrf.mxu0 }
 0x30d   : > { %2445 = vrcp.f32 %v1485_v34  ;;  %v1483_v40 = vadd.f32 1.0, %v2428_v37  ;;  %v1436_v41 = vmul.f32 1.442695, %v1395_v35  ;;  %v1400_v42 = vsub.f32 0.0, %v1316_v36 }
 0x30e   : > { %v2430_v43 = vpop.eup %2429  ;;  %2447 = vpow2.f32 %v1440_v38  ;;  %v1308_v20 = vadd.f32 %v3168_v29, %v1307_v39  ;;  %v2249_v44 = vpop.f32.mrf.mxu0 }
 0x30f   : > { %2449 = vrcp.f32 %v1483_v40  ;;  %v1488_v46 = vadd.f32 1.0, %v2430_v43  ;;  %v1446_v47 = vmul.f32 1.442695, %v1400_v42  ;;  %v1319_v48 = vadd.f32 %v2249_v44, %v3168_v29 }
 0x310   : > { %v2432_v49 = vpop.eup %2431  ;;  %2451 = vpow2.f32 %v1436_v41  ;;  %v1398_v59 = vsub.f32 0.0, %v1308_v20  ;;  %v1310_v50 = vpop.f32.mrf.mxu0 }
 0x311   : > { %2453 = vrcp.f32 %v1488_v46  ;;  %v1486_v51 = vadd.f32 1.0, %v2432_v49  ;;  %v1401_v52 = vsub.f32 0.0, %v1319_v48  ;;  %v1311_v53 = vadd.f32 %v3168_v29, %v1310_v50 }
 0x312   : > { %v2434_v54 = vpop.eup %2433  ;;  %2455 = vpow2.f32 %v1446_v47  ;;  %v1442_v55 = vmul.f32 1.442695, %v1398_v59  ;;  %v2252_v45 = vpop.f32.mrf.mxu0 }
 0x313   : > { %2457 = vrcp.f32 %v1486_v51  ;;  %v1489_v56 = vadd.f32 1.0, %v2434_v54  ;;  %v1448_v9 = vmul.f32 1.442695, %v1401_v52  ;;  %v1399_v57 = vsub.f32 0.0, %v1311_v53 }
 0x314   : > { %v2436_v58 = vpop.eup %2435  ;;  %2459 = vpow2.f32 %v1442_v55  ;;  %v1332_v60 = vadd.f32 %v2252_v45, %v3168_v29  ;;  %v1323_v61 = vpop.f32.mrf.mxu0 }
 0x315   : > { %2461 = vrcp.f32 %v1489_v56  ;;  %v1487_v62 = vadd.f32 1.0, %v2436_v58  ;;  %v1444_v63 = vmul.f32 1.442695, %v1399_v57  ;;  %v1324_v0 = vadd.f32 %v3168_v29, %v1323_v61 }
 0x316   : > { %v2438_v1 = vpop.eup %2437  ;;  %2463 = vpow2.f32 %v1448_v9  ;;  %v1404_v2 = vsub.f32 0.0, %v1332_v60  ;;  %v2253_v3 = vpop.f32.mrf.mxu0 }
 0x317   : > { %v2440_v4 = vpop.eup %2439  ;;  %1549 = vst.msk [vmem:[%s3189_s13 + $0x10] sm:$0xff] %vm1546_vm0, %v2438_v1  ;;  %2465 = vrcp.f32 %v1487_v62  ;;  %v1402_v5 = vsub.f32 0.0, %v1324_v0  ;;  %v1335_v7 = vadd.f32 %v2253_v3, %v3168_v29 }
 0x318   : > { %v2442_v10 = vpop.eup %2441  ;;  %v1492_v8 = vadd.f32 1.0, %v2440_v4  ;;  %2467 = vpow2.f32 %v1444_v63  ;;  %v1454_v12 = vmul.f32 1.442695, %v1404_v2  ;;  %v1326_v13 = vpop.f32.mrf.mxu0 }
 0x319   : > { %v2444_v14 = vpop.eup %2443  ;;  %1547 = vst.msk [vmem:[%s3189_s13] sm:$0xff] %vm1546_vm0, %v2442_v10  ;;  %v1450_v15 = vmul.f32 1.442695, %v1402_v5  ;;  %v1405_v16 = vsub.f32 0.0, %v1335_v7  ;;  %v1327_v17 = vadd.f32 %v3168_v29, %v1326_v13 }
 0x31a   : > { %v2446_v18 = vpop.eup %2445  ;;  %2469 = vrcp.f32 %v1492_v8  ;;  %v1490_v19 = vadd.f32 1.0, %v2444_v14  ;;  %v2256_v21 = vpop.f32.mrf.mxu0 }
 0x31b   : > { %v2448_v22 = vpop.eup %2447  ;;  %1550 = vst.msk [vmem:[%s3189_s13 + $0x18] sm:$0xff] %vm1546_vm0, %v2446_v18  ;;  %2471 = vpow2.f32 %v1454_v12  ;;  %v1456_v23 = vmul.f32 1.442695, %v1405_v16  ;;  %v1403_v24 = vsub.f32 0.0, %v1327_v17  ;;  %v1348_v26 = vadd.f32 %v2256_v21, %v3168_v29 }
 0x31c   : > { %v2450_v27 = vpop.eup %2449  ;;  %2473 = vrcp.f32 %v1490_v19  ;;  %v1493_v28 = vadd.f32 1.0, %v2448_v22  ;;  %v1339_v30 = vpop.f32.mrf.mxu0 }
 0x31d   : > { %v2452_v31 = vpop.eup %2451  ;;  %1548 = vst.msk [vmem:[%s3189_s13 + $0x8] sm:$0xff] %vm1546_vm0, %v2450_v27  ;;  %2475 = vpow2.f32 %v1450_v15  ;;  %v1452_v25 = vmul.f32 1.442695, %v1403_v24  ;;  %v1408_v32 = vsub.f32 0.0, %v1348_v26  ;;  %v1340_v33 = vadd.f32 %v3168_v29, %v1339_v30 }
 0x31e   : > { %v2454_v6 = vpop.eup %2453  ;;  %2477 = vrcp.f32 %v1493_v28  ;;  %v1491_v11 = vadd.f32 1.0, %v2452_v31  ;;  %v2257_v34 = vpop.f32.mrf.mxu0 }
 0x31f   : > { %v2456_v35 = vpop.eup %2455  ;;  %1553 = vst.msk [vmem:[%s3189_s13 + $0x30] sm:$0xff] %vm1546_vm0, %v2454_v6  ;;  %2479 = vpow2.f32 %v1456_v23  ;;  %v1462_v36 = vmul.f32 1.442695, %v1408_v32  ;;  %v1406_v37 = vsub.f32 0.0, %v1340_v33  ;;  %v1351_v38 = vadd.f32 %v2257_v34, %v3168_v29 }
 0x320   : > { %v2458_v39 = vpop.eup %2457  ;;  %2481 = vrcp.f32 %v1491_v11  ;;  %v1496_v40 = vadd.f32 1.0, %v2456_v35  ;;  %v1342_v41 = vpop.f32.mrf.mxu0 }
 0x321   : > { %v2460_v42 = vpop.eup %2459  ;;  %1551 = vst.msk [vmem:[%s3189_s13 + $0x20] sm:$0xff] %vm1546_vm0, %v2458_v39  ;;  %2483 = vpow2.f32 %v1452_v25  ;;  %v1458_v43 = vmul.f32 1.442695, %v1406_v37  ;;  %v1409_v20 = vsub.f32 0.0, %v1351_v38  ;;  %v1343_v44 = vadd.f32 %v3168_v29, %v1342_v41 }
 0x322   : > { %v2462_v46 = vpop.eup %2461  ;;  %2485 = vrcp.f32 %v1496_v40  ;;  %v1494_v47 = vadd.f32 1.0, %v2460_v42  ;;  %v2260_v48 = vpop.f32.mrf.mxu0 }
 0x323   : > { %v2464_v49 = vpop.eup %2463  ;;  %1554 = vst.msk [vmem:[%s3189_s13 + $0x38] sm:$0xff] %vm1546_vm0, %v2462_v46  ;;  %2487 = vpow2.f32 %v1462_v36  ;;  %v1464_v59 = vmul.f32 1.442695, %v1409_v20  ;;  %v1407_v50 = vsub.f32 0.0, %v1343_v44  ;;  %v1364_v51 = vadd.f32 %v2260_v48, %v3168_v29 }
 0x324   : > { %v2466_v52 = vpop.eup %2465  ;;  %2489 = vrcp.f32 %v1494_v47  ;;  %v1497_v53 = vadd.f32 1.0, %v2464_v49  ;;  %v1355_v54 = vpop.f32.mrf.mxu0 }
 0x325   : > { %v2468_v55 = vpop.eup %2467  ;;  %1552 = vst.msk [vmem:[%s3189_s13 + $0x28] sm:$0xff] %vm1546_vm0, %v2466_v52  ;;  %2491 = vpow2.f32 %v1458_v43  ;;  %v1460_v45 = vmul.f32 1.442695, %v1407_v50  ;;  %v1412_v56 = vsub.f32 0.0, %v1364_v51  ;;  %v1356_v9 = vadd.f32 %v3168_v29, %v1355_v54 }
 0x326   : > { %2493 = vrcp.f32 %v1497_v53  ;;  %v1495_v57 = vadd.f32 1.0, %v2468_v55  ;;  %v2261_v58 = vpop.f32.mrf.mxu0 }
 0x327   : > { %v2470_v60 = vpop.eup %2469  ;;  %2495 = vpow2.f32 %v1464_v59  ;;  %v1470_v61 = vmul.f32 1.442695, %v1412_v56  ;;  %v1410_v62 = vsub.f32 0.0, %v1356_v9  ;;  %v1367_v63 = vadd.f32 %v2261_v58, %v3168_v29 }
 0x328   : > { %v2472_v0 = vpop.eup %2471  ;;  %1557 = vst.msk [vmem:[%s3189_s13 + $0x50] sm:$0xff] %vm1546_vm0, %v2470_v60  ;;  %2497 = vrcp.f32 %v1495_v57  ;;  %v1358_v1 = vpop.f32.mrf.mxu0 }
 0x329   : > { %v2474_v2 = vpop.eup %2473  ;;  %v1500_v3 = vadd.f32 1.0, %v2472_v0  ;;  %2499 = vpow2.f32 %v1460_v45  ;;  %v1466_v4 = vmul.f32 1.442695, %v1410_v62  ;;  %v1413_v5 = vsub.f32 0.0, %v1367_v63 }
 0x32a   : > { %v2476_v7 = vpop.eup %2475  ;;  %1555 = vst.msk [vmem:[%s3189_s13 + $0x40] sm:$0xff] %vm1546_vm0, %v2474_v2  ;;  %2501 = vpow2.f32 %v1470_v61  ;;  %v1359_v10 = vadd.f32 %v3168_v29, %v1358_v1  ;;  %v2264_v8 = vpop.f32.mrf.mxu0 }
 0x32b   : > { %v2478_v12 = vpop.eup %2477  ;;  %2503 = vrcp.f32 %v1500_v3  ;;  %v1498_v13 = vadd.f32 1.0, %v2476_v7  ;;  %v1472_v14 = vmul.f32 1.442695, %v1413_v5  ;;  %v1380_v15 = vadd.f32 %v2264_v8, %v3168_v29 }
 0x32c   : > { %v2480_v16 = vpop.eup %2479  ;;  %1558 = vst.msk [vmem:[%s3189_s13 + $0x58] sm:$0xff] %vm1546_vm0, %v2478_v12  ;;  %2505 = vpow2.f32 %v1466_v4  ;;  %v1411_v17 = vsub.f32 0.0, %v1359_v10  ;;  %v1371_v18 = vpop.f32.mrf.mxu0 }
 0x32d   : > { %v2482_v19 = vpop.eup %2481  ;;  %2507 = vrcp.f32 %v1498_v13  ;;  %v1501_v21 = vadd.f32 1.0, %v2480_v16  ;;  %v1416_v22 = vsub.f32 0.0, %v1380_v15  ;;  %v1372_v23 = vadd.f32 %v3168_v29, %v1371_v18 }
 0x32e   : > { %v2484_v24 = vpop.eup %2483  ;;  %1556 = vst.msk [vmem:[%s3189_s13 + $0x48] sm:$0xff] %vm1546_vm0, %v2482_v19  ;;  %2509 = vpow2.f32 %v1472_v14  ;;  %v1468_v26 = vmul.f32 1.442695, %v1411_v17  ;;  %v2265_v27 = vpop.f32.mrf.mxu0 }
 0x32f   : > { %v2486_v28 = vpop.eup %2485  ;;  %2511 = vrcp.f32 %v1501_v21  ;;  %v1499_v30 = vadd.f32 1.0, %v2484_v24  ;;  %v1478_v31 = vmul.f32 1.442695, %v1416_v22  ;;  %v1414_v25 = vsub.f32 0.0, %v1372_v23 }
 0x330   : > { %v2488_v32 = vpop.eup %2487  ;;  %1561 = vst.msk [vmem:[%s3189_s13 + $0x70] sm:$0xff] %vm1546_vm0, %v2486_v28  ;;  %2513 = vpow2.f32 %v1468_v26  ;;  %v1383_v33 = vadd.f32 %v2265_v27, %v3168_v29  ;;  %v1374_v6 = vpop.f32.mrf.mxu0 }
 0x331   : > { %v2490_v11 = vpop.eup %2489  ;;  %2515 = vrcp.f32 %v1499_v30  ;;  %v1504_v34 = vadd.f32 1.0, %v2488_v32  ;;  %v1474_v35 = vmul.f32 1.442695, %v1414_v25  ;;  %v1375_v36 = vadd.f32 %v3168_v29, %v1374_v6 }
 0x332   : > { %v2492_v37 = vpop.eup %2491  ;;  %1559 = vst.msk [vmem:[%s3189_s13 + $0x60] sm:$0xff] %vm1546_vm0, %v2490_v11  ;;  %2517 = vpow2.f32 %v1478_v31  ;;  %v1417_v38 = vsub.f32 0.0, %v1383_v33 }
 0x333   : > { %v2494_v39 = vpop.eup %2493  ;;  %2519 = vrcp.f32 %v1504_v34  ;;  %v1502_v40 = vadd.f32 1.0, %v2492_v37  ;;  %v1415_v41 = vsub.f32 0.0, %v1375_v36 }
 0x334   : > { %v2496_v42 = vpop.eup %2495  ;;  %1562 = vst.msk [vmem:[%s3189_s13 + $0x78] sm:$0xff] %vm1546_vm0, %v2494_v39  ;;  %2521 = vpow2.f32 %v1474_v35  ;;  %v1480_v43 = vmul.f32 1.442695, %v1417_v38 }
 0x335   : > { %v2498_v20 = vpop.eup %2497  ;;  %2523 = vrcp.f32 %v1502_v40  ;;  %v1505_v44 = vadd.f32 1.0, %v2496_v42  ;;  %v1476_v29 = vmul.f32 1.442695, %v1415_v41 }
 0x336   : > { %v2500_v46 = vpop.eup %2499  ;;  %1560 = vst.msk [vmem:[%s3189_s13 + $0x68] sm:$0xff] %vm1546_vm0, %v2498_v20  ;;  %2525 = vpow2.f32 %v1480_v43 }
 0x337   : > { %v2502_v47 = vpop.eup %2501  ;;  %2527 = vrcp.f32 %v1505_v44  ;;  %v1503_v48 = vadd.f32 1.0, %v2500_v46 }
 0x338   : > { %v2504_v49 = vpop.eup %2503  ;;  %v1508_v59 = vadd.f32 1.0, %v2502_v47  ;;  %2529 = vpow2.f32 %v1476_v29 }
 0x339   : > { %v2506_v50 = vpop.eup %2505  ;;  %1565 = vst.msk [vmem:[%s3189_s13 + $0x90] sm:$0xff] %vm1546_vm0, %v2504_v49  ;;  %2531 = vrcp.f32 %v1503_v48 }
 0x33a   : > { %v2508_v51 = vpop.eup %2507  ;;  %2533 = vrcp.f32 %v1508_v59  ;;  %v1506_v52 = vadd.f32 1.0, %v2506_v50 }
 0x33b   : > { %v2510_v53 = vpop.eup %2509  ;;  %1563 = vst.msk [vmem:[%s3189_s13 + $0x80] sm:$0xff] %vm1546_vm0, %v2508_v51 }
 0x33c   : > { %v2512_v54 = vpop.eup %2511  ;;  %2535 = vrcp.f32 %v1506_v52  ;;  %v1509_v55 = vadd.f32 1.0, %v2510_v53 }
 0x33d   : > { %v2514_v45 = vpop.eup %2513  ;;  %1566 = vst.msk [vmem:[%s3189_s13 + $0x98] sm:$0xff] %vm1546_vm0, %v2512_v54 }
 0x33e   : > { %v2516_v56 = vpop.eup %2515  ;;  %2537 = vrcp.f32 %v1509_v55  ;;  %v1507_v9 = vadd.f32 1.0, %v2514_v45 }
 0x33f   : > { %v2518_v57 = vpop.eup %2517  ;;  %1564 = vst.msk [vmem:[%s3189_s13 + $0x88] sm:$0xff] %vm1546_vm0, %v2516_v56 }
 0x340   : > { %v2520_v58 = vpop.eup %2519  ;;  %2539 = vrcp.f32 %v1507_v9  ;;  %v1512_v60 = vadd.f32 1.0, %v2518_v57 }
 0x341   : > { %v2522_v61 = vpop.eup %2521  ;;  %1569 = vst.msk [vmem:[%s3189_s13 + $0xb0] sm:$0xff] %vm1546_vm0, %v2520_v58 }
 0x342   : > { %v2524_v62 = vpop.eup %2523  ;;  %2541 = vrcp.f32 %v1512_v60  ;;  %v1510_v63 = vadd.f32 1.0, %v2522_v61 }
 0x343   : > { %v2526_v0 = vpop.eup %2525  ;;  %1567 = vst.msk [vmem:[%s3189_s13 + $0xa0] sm:$0xff] %vm1546_vm0, %v2524_v62 }
 0x344   : > { %v2528_v1 = vpop.eup %2527  ;;  %2543 = vrcp.f32 %v1510_v63  ;;  %v1513_v2 = vadd.f32 1.0, %v2526_v0 }
 0x345   : > { %v2530_v3 = vpop.eup %2529  ;;  %1570 = vst.msk [vmem:[%s3189_s13 + $0xb8] sm:$0xff] %vm1546_vm0, %v2528_v1 }
 0x346   : > { %v2532_v4 = vpop.eup %2531  ;;  %2545 = vrcp.f32 %v1513_v2  ;;  %v1511_v5 = vadd.f32 1.0, %v2530_v3 }
 0x347   : > { %v2534_v7 = vpop.eup %2533  ;;  %1568 = vst.msk [vmem:[%s3189_s13 + $0xa8] sm:$0xff] %vm1546_vm0, %v2532_v4 }
 0x348   : > { %1573 = vst.msk [vmem:[%s3189_s13 + $0xd0] sm:$0xff] %vm1546_vm0, %v2534_v7  ;;  %2547 = vrcp.f32 %v1511_v5 }
 0x349   : > { %v2536_v10 = vpop.eup %2535 }
 0x34a   : > { %1571 = vst.msk [vmem:[%s3189_s13 + $0xc0] sm:$0xff] %vm1546_vm0, %v2536_v10 }
 0x34b   : > { %v2538_v8 = vpop.eup %2537 }
 0x34c   : > { %1574 = vst.msk [vmem:[%s3189_s13 + $0xd8] sm:$0xff] %vm1546_vm0, %v2538_v8 }
 0x34d   : > { %v2540_v12 = vpop.eup %2539 }
 0x34e   : > { %1572 = vst.msk [vmem:[%s3189_s13 + $0xc8] sm:$0xff] %vm1546_vm0, %v2540_v12 }
 0x34f   : > { %v2542_v13 = vpop.eup %2541 }
 0x350   : > { %1577 = vst.msk [vmem:[%s3189_s13 + $0xf0] sm:$0xff] %vm1546_vm0, %v2542_v13 }
 0x351   : > { %v2544_v14 = vpop.eup %2543 }
 0x352   : > { %1575 = vst.msk [vmem:[%s3189_s13 + $0xe0] sm:$0xff] %vm1546_vm0, %v2544_v14  ;;  %1585 = sbr.rel (!%p3432_p1) target bundleno = 903 (0x387), region = 68 }
 0x353   : > { %v2546_v15 = vpop.eup %2545 }
 0x354   : > { %1578 = vst.msk [vmem:[%s3189_s13 + $0xf8] sm:$0xff] %vm1546_vm0, %v2546_v15 }
 0x355   : > { %v2548_v16 = vpop.eup %2547 }
 0x356   : > { %1576 = vst.msk [vmem:[%s3189_s13 + $0xe8] sm:$0xff] %vm1546_vm0, %v2548_v16 }
 0x357   : > { %s3448_s12 = smov (!%p1588_p6, %s1587_s12), 32 }
 0x358   : > { %s2030_s25 = sshll.u32 %s3448_s12, 7 }
 0x359   : > { %p2033_p7 = scmp.eq.s32.totalorder %s2030_s25, 0 }
 0x35a   : > { %s3282_s16 = sshrl.u32 (!%p2033_p7), %s3448_s12, 5 }
 0x35b   : > { %1596 = sbr.rel (%p2033_p7) target bundleno = 903 (0x387), region = 72  ;;  %p2034_p9 = scmp.le.s32.totalorder (!%p2033_p7), %s3282_s16, 0 }
 0x360   : > { %1897 = sbr.rel (%p2034_p9) target bundleno = 886 (0x376), region = 163  ;;  %s3433_s9 = smov (!%p2034_p9), %s3276_s24 }
 0x361   : > { %s3434_s27 = smov (!%p2034_p9), %s3189_s13  ;;  %s3291_s21 = smov (!%p2034_p9), 0  }
 0x362   : > { %s3293_s17 = smov (!%p2034_p9), 0  }
 0x365 LB: >> { %v1721_v17 = vld [vmem:[%s2709_s27] sm:$0xff]  ;;  %v1723_v18 = vld [vmem:[%s2709_s27 + $0x8] sm:$0xff]  ;;  %v1725_v19 = vld [vmem:[%s2709_s27 + $0x10] sm:$0xff]  ;;  %s1785_s26 = sadd.s32 1, %s2713_s21  ;;  %s1715_s17 = sadd.s32 1, %s2717_s17   ;;  %s2717_s17 = sphi %s3293_s17, %s1715_s17   ;;  %s2713_s21 = sphi %s3291_s21, %s3437_s21   ;;  %s2709_s27 = sphi %s3434_s27, %s3436_s27   ;;  %s2705_s9 = sphi %s3433_s9, %s3435_s9  }
 0x366   : >> { %1722 = vst [vmem:[%s2705_s9] sm:$0xff] %v1721_v17  ;;  %1724 = vst [vmem:[%s2705_s9 + $0x8] sm:$0xff] %v1723_v18  ;;  %v1727_v21 = vld [vmem:[%s2709_s27 + $0x18] sm:$0xff]  ;;  %v1729_v22 = vld [vmem:[%s2709_s27 + $0x20] sm:$0xff]  ;;  %p1786_p8 = scmp.ge.s32.totalorder %s1785_s26, %s3282_s16  ;;  %p1714_p12 = scmp.ge.s32.totalorder %s1715_s17, %s3282_s16 }
 0x367   : >> { %1726 = vst [vmem:[%s2705_s9 + $0x10] sm:$0xff] %v1725_v19  ;;  %v1731_v23 = vld [vmem:[%s2709_s27 + $0x28] sm:$0xff]  ;;  %1728 = vst [vmem:[%s2705_s9 + $0x18] sm:$0xff] %v1727_v21  ;;  %v1733_v24 = vld [vmem:[%s2709_s27 + $0x30] sm:$0xff] }
 0x368   : >> { %1730 = vst [vmem:[%s2705_s9 + $0x20] sm:$0xff] %v1729_v22  ;;  %1732 = vst [vmem:[%s2705_s9 + $0x28] sm:$0xff] %v1731_v23  ;;  %v1735_v26 = vld [vmem:[%s2709_s27 + $0x38] sm:$0xff]  ;;  %v1737_v27 = vld [vmem:[%s2709_s27 + $0x40] sm:$0xff]  ;;  %s3450_s26 = smov (%p1786_p8, %s1785_s26), 0 }
 0x369   : >> { %1734 = vst [vmem:[%s2705_s9 + $0x30] sm:$0xff] %v1733_v24  ;;  %1736 = vst [vmem:[%s2705_s9 + $0x38] sm:$0xff] %v1735_v26  ;;  %v1739_v28 = vld [vmem:[%s2709_s27 + $0x48] sm:$0xff]  ;;  %v1741_v30 = vld [vmem:[%s2709_s27 + $0x50] sm:$0xff]  ;;  %s2035_s30 = sshll.u32 %s3450_s26, 8  ;;  %s3437_s21 = smov %s3450_s26 }
 0x36a   : >> { %1738 = vst [vmem:[%s2705_s9 + $0x40] sm:$0xff] %v1737_v27  ;;  %v1743_v31 = vld [vmem:[%s2709_s27 + $0x58] sm:$0xff]  ;;  %1740 = vst [vmem:[%s2705_s9 + $0x48] sm:$0xff] %v1739_v28  ;;  %v1745_v25 = vld [vmem:[%s2709_s27 + $0x60] sm:$0xff]  ;;  %s3349_s23 = scalar_lea.vmem %s3189_s13, %s2035_s30 [#allocation7]   ;;  %s1791_s4 = scalar_lea.vmem %s3276_s24, %s2035_s30  }
 0x36b   : >> { %1742 = vst [vmem:[%s2705_s9 + $0x50] sm:$0xff] %v1741_v30  ;;  %1744 = vst [vmem:[%s2705_s9 + $0x58] sm:$0xff] %v1743_v31  ;;  %v1747_v32 = vld [vmem:[%s2709_s27 + $0x68] sm:$0xff]  ;;  %v1749_v33 = vld [vmem:[%s2709_s27 + $0x70] sm:$0xff] }
 0x36c   : >> { %1746 = vst [vmem:[%s2705_s9 + $0x60] sm:$0xff] %v1745_v25  ;;  %1748 = vst [vmem:[%s2705_s9 + $0x68] sm:$0xff] %v1747_v32  ;;  %v1751_v6 = vld [vmem:[%s2709_s27 + $0x78] sm:$0xff]  ;;  %v1753_v11 = vld [vmem:[%s2709_s27 + $0x80] sm:$0xff] }
 0x36d   : >> { %1750 = vst [vmem:[%s2705_s9 + $0x70] sm:$0xff] %v1749_v33  ;;  %v1755_v34 = vld [vmem:[%s2709_s27 + $0x88] sm:$0xff]  ;;  %1752 = vst [vmem:[%s2705_s9 + $0x78] sm:$0xff] %v1751_v6  ;;  %v1757_v35 = vld [vmem:[%s2709_s27 + $0x90] sm:$0xff] }
 0x36e   : >> { %1754 = vst [vmem:[%s2705_s9 + $0x80] sm:$0xff] %v1753_v11  ;;  %1756 = vst [vmem:[%s2705_s9 + $0x88] sm:$0xff] %v1755_v34  ;;  %v1759_v36 = vld [vmem:[%s2709_s27 + $0x98] sm:$0xff]  ;;  %v1761_v37 = vld [vmem:[%s2709_s27 + $0xa0] sm:$0xff] }
 0x36f   : >> { %1758 = vst [vmem:[%s2705_s9 + $0x90] sm:$0xff] %v1757_v35  ;;  %1760 = vst [vmem:[%s2705_s9 + $0x98] sm:$0xff] %v1759_v36  ;;  %v1763_v38 = vld [vmem:[%s2709_s27 + $0xa8] sm:$0xff]  ;;  %v1765_v39 = vld [vmem:[%s2709_s27 + $0xb0] sm:$0xff] }
 0x370   : >> { %1762 = vst [vmem:[%s2705_s9 + $0xa0] sm:$0xff] %v1761_v37  ;;  %v1767_v40 = vld [vmem:[%s2709_s27 + $0xb8] sm:$0xff]  ;;  %1764 = vst [vmem:[%s2705_s9 + $0xa8] sm:$0xff] %v1763_v38  ;;  %v1769_v41 = vld [vmem:[%s2709_s27 + $0xc0] sm:$0xff] }
 0x371   : >> { %1766 = vst [vmem:[%s2705_s9 + $0xb0] sm:$0xff] %v1765_v39  ;;  %1768 = vst [vmem:[%s2705_s9 + $0xb8] sm:$0xff] %v1767_v40  ;;  %v1771_v42 = vld [vmem:[%s2709_s27 + $0xc8] sm:$0xff]  ;;  %v1773_v43 = vld [vmem:[%s2709_s27 + $0xd0] sm:$0xff]  ;;  %1717 = sbr.rel (!%p1714_p12) target bundleno = 869 (0x365), region = 169 }
 0x372   : >> { %1770 = vst [vmem:[%s2705_s9 + $0xc0] sm:$0xff] %v1769_v41  ;;  %1772 = vst [vmem:[%s2705_s9 + $0xc8] sm:$0xff] %v1771_v42  ;;  %v1775_v20 = vld [vmem:[%s2709_s27 + $0xd8] sm:$0xff]  ;;  %v1777_v44 = vld [vmem:[%s2709_s27 + $0xe0] sm:$0xff] }
 0x373   : >> { %1774 = vst [vmem:[%s2705_s9 + $0xd0] sm:$0xff] %v1773_v43  ;;  %v1779_v29 = vld [vmem:[%s2709_s27 + $0xe8] sm:$0xff]  ;;  %1776 = vst [vmem:[%s2705_s9 + $0xd8] sm:$0xff] %v1775_v20  ;;  %v1781_v46 = vld [vmem:[%s2709_s27 + $0xf0] sm:$0xff] }
 0x374   : >> { %1778 = vst [vmem:[%s2705_s9 + $0xe0] sm:$0xff] %v1777_v44  ;;  %1780 = vst [vmem:[%s2705_s9 + $0xe8] sm:$0xff] %v1779_v29  ;;  %v1783_v47 = vld [vmem:[%s2709_s27 + $0xf8] sm:$0xff]  ;;  %s3436_s27 = smov %s3349_s23 }
 0x375   : >> { %1782 = vst [vmem:[%s2705_s9 + $0xf0] sm:$0xff] %v1781_v46  ;;  %1784 = vst [vmem:[%s2705_s9 + $0xf8] sm:$0xff] %v1783_v47  ;;  %s3435_s9 = smov %s1791_s4 }
 0x376 PF: > { %s3390_s11 = sand.u32 31, %s3448_s12   ;;  %s2048_s18 = sshll.u32 %s3282_s16, 8 }
 0x377   : > { %s1796_s15 = scalar_lea.vmem %s3189_s13, %s2048_s18 [#allocation7]   ;;  %s1798_s19 = scalar_lea.vmem %s3276_s24, %s2048_s18  }
 0x378   : > { %p2040_p13 = scmp.le.s32.totalorder %s3390_s11, 0 }
 0x379   : > { %s2719_s22 = smov (!%p2040_p13), %s1798_s19   ;;  %s2723_s14 = smov (!%p2040_p13), %s1796_s15  }
 0x37a   : > { %1911 = sbr.rel (%p2040_p13) target bundleno = 903 (0x387), region = 174  ;;  %s2727_s20 = smov (!%p2040_p13), 0  }
 0x37b   : > { %s2731_s25 = smov (!%p2040_p13), 0  }
 0x37f LB: >> { %v1808_v48 = vld [vmem:[%s2725_s14] sm:$0xff]  ;;  %s1810_s12 = sadd.s32 1, %s2729_s20  ;;  %s1802_s25 = sadd.s32 1, %s2733_s25   ;;  %s2733_s25 = sphi %s2731_s25, %s1802_s25   ;;  %s2729_s20 = sphi %s2727_s20, %s2728_s20   ;;  %s2725_s14 = sphi %s2723_s14, %s1815_s14   ;;  %s2721_s22 = sphi %s2719_s22, %s1816_s22  }
 0x380   : >> { %1809 = vst [vmem:[%s2721_s22] sm:$0xff] %v1808_v48  ;;  %p1811_p2 = scmp.ge.s32.totalorder %s1810_s12, %s3390_s11  ;;  %p1801_p5 = scmp.ge.s32.totalorder %s1802_s25, %s3390_s11 }
 0x382   : >> { %s3452_s12 = smov (%p1811_p2, %s1810_s12), 0  ;;  %1804 = sbr.rel (!%p1801_p5) target bundleno = 895 (0x37f), region = 180 }
 0x383   : >> { %s2041_s13 = sshll.u32 %s3452_s12, 3  ;;  %s2728_s20 = smov %s3452_s12  }
 0x384   : >> { %s1815_s14 = scalar_lea.vmem %s1796_s15, %s2041_s13 [#allocation7]   ;;  %s1816_s22 = scalar_lea.vmem %s1798_s19, %s2041_s13  }
 0x387 PF: > { %s3438_s24 = sld [smem:[#allocation11_spill]]  ;;  %p21_p10 = scmp.ge.s32.totalorder %s2811_s10, 5  }
 0x388   : > { %s3439_s27 = smov %s2693_s28  ;;  %s3440_s28 = smov %s2697_s29 }
 0x389   : > { %s3442_s30 = smov %s2811_s10  ;;  %23 = sbr.rel (!%p21_p10) target bundleno = 7 (0x7), region = 191 }
 0x38d   : > { %s3441_s29 = smov %s3438_s24 }
 0x38e   :  { %1832 = vsyncpa [#allocation3], 1 }
 0x38f   :  { %1834 = vsyncpa [#allocation3 + $0x1], 1 }
 0x390   :  { %1835 = vsyncpa [#allocation5], 1 }
 0x391   :  { %1837 = vsyncpa [#allocation5 + $0x1], 1 }

</bundles_post_ra>
